<compile_context>
chip_gen: v5e
topology: v5e:2x2
jax: 0.10.0
libtpu: 0.0.40
codegen_flags: <defaults>
</compile_context>

<pallas_src>
import functools
import math

import jax
import jax.numpy as jnp
from jax.experimental import pallas as pl
from jax.experimental.pallas import tpu as pltpu


VMEM_LIMIT_BYTES = 48 * 1024 * 1024  # leave headroom on v7x (64 MiB physical VMEM)


def _round_up(x, m):
    return -(-x // m) * m


# ----------------------------------------------------------------------------
# Pallas kernels
# ----------------------------------------------------------------------------

def _conv3x3_kernel(x_ref, w_ref, s_ref, b_ref, o_ref, acc_ref, *, stride, wq):
    """3x3 conv (+ folded tdBN affine) for one image.

    x_ref : (1, P, Lin, Cin) bf16  flattened (phased) padded input, P = stride**2
    w_ref : (9, Cin, Cout)   bf16
    s_ref : (1, Cout)        f32   tdBN scale
    b_ref : (1, Cout)        f32   tdBN bias
    o_ref : (1, Lout, Cout)  bf16  flattened output (Lout = Ho*Wq, garbage cols cropped
                                   by the wrapper)
    acc_ref: (Lout, Cout) f32 VMEM accumulator (accumulation happens inside one grid step,
             so a single scratch is cheaper than carrying an f32 output block).
    """
    l_out = o_ref.shape[1]
    for ky in range(3):
        for kx in range(3):
            p = (ky % stride) * stride + (kx % stride)
            off = (ky // stride) * wq + (kx // stride)
            xt = x_ref[0, p, off:off + l_out, :]                 # (Lout, Cin) bf16
            contrib = jnp.dot(xt, w_ref[ky * 3 + kx],
                              preferred_element_type=jnp.float32)
            if ky == 0 and kx == 0:
                acc_ref[...] = contrib
            else:
                acc_ref[...] += contrib
    o_ref[0] = (acc_ref[...] * s_ref[...] + b_ref[...]).astype(o_ref.dtype)


def _affine_matmul_kernel(x_ref, w_ref, s_ref, b_ref, o_ref):
    """out = (x @ w) * scale + bias on a (TM, TN) tile (used for 1x1 convs and FC)."""
    acc = jnp.dot(x_ref[...], w_ref[...], preferred_element_type=jnp.float32)
    o_ref[...] = (acc * s_ref[...] + b_ref[...]).astype(o_ref.dtype)


def _lif_kernel(x_ref, o_ref, *, beta, threshold):
    # snntorch Leaky(init_hidden=True, reset_mechanism="subtract"):
    #   mem_t = beta * mem_{t-1} + x_t - spk_{t-1} * threshold
    #   spk_t = heaviside(mem_t - threshold)
    # TODO(synk): surrogate gradient (ATan) affects backward only; forward is Heaviside.
    x = x_ref[...].astype(jnp.float32)                           # (T, TILE_M)
    T = x.shape[0]
    mem = jnp.zeros((1, x.shape[1]), jnp.float32)
    spk = jnp.zeros_like(mem)
    rows = []
    for t in range(T):                                           # T small & static -> unrolled
        mem = beta * mem + x[t:t + 1, :] - spk * threshold
        spk = (mem > threshold).astype(jnp.float32)
        rows.append(spk)
    o_ref[...] = jnp.concatenate(rows, axis=0).astype(o_ref.dtype)


def _lif_res_kernel(x_ref, r_ref, o_ref, *, beta, threshold):
    """LIF with the residual add fused in (x + identity before the neuron dynamics)."""
    x = x_ref[...].astype(jnp.float32) + r_ref[...].astype(jnp.float32)
    T = x.shape[0]
    mem = jnp.zeros((1, x.shape[1]), jnp.float32)
    spk = jnp.zeros_like(mem)
    rows = []
    for t in range(T):
        mem = beta * mem + x[t:t + 1, :] - spk * threshold
        spk = (mem > threshold).astype(jnp.float32)
        rows.append(spk)
    o_ref[...] = jnp.concatenate(rows, axis=0).astype(o_ref.dtype)


def _gap_kernel(x_ref, o_ref):
    o_ref[...] = jnp.mean(x_ref[...].astype(jnp.float32), axis=1).astype(o_ref.dtype)


# ----------------------------------------------------------------------------
# Layer wrappers
# ----------------------------------------------------------------------------

def conv3x3_bn(x, w, scale, bias, stride=1):
    """conv3x3(pad=1, bias=False) + folded tdBN.  x: [N,H,W,Cin] -> [N,Ho,Wo,Cout] bf16."""
    N, H, W, Cin = x.shape
    Cout = w.shape[-1]
    Ho, Wo = H // stride, W // stride

    # Pad channels (stem: 3 -> 128) so the lane dim is vreg/MXU friendly (zeros are inert).
    Cp = _round_up(Cin, 128)
    # Halo pad: 1 top/left col+row; bottom gets (1 + stride) extra rows so every flattened
    # tap window is a contiguous, in-bounds slice (no extra flat-dim HBM pad pass needed).
    xp = jnp.pad(x.astype(jnp.bfloat16),
                 ((0, 0), (1, 1 + stride), (1, 1), (0, Cp - Cin)))

    if stride == 1:
        Wq = W + 2
        phases = xp[:, None]                                     # [N,1,H+3,W+2,Cp]
    else:
        # space-to-depth phases of the padded input: output-resolution taps only.
        Wq = (W + 2) // 2
        phases = jnp.stack([xp[:, r::2, c::2, :] for r in range(2) for c in range(2)],
                           axis=1)                               # [N,4,(H+4)//2,Wq,Cp]
    P = phases.shape[1]
    Lin = phases.shape[2] * phases.shape[3]
    phases = phases.reshape(N, P, Lin, Cp)
    Lout = Ho * Wq

    wk = jnp.pad(w, ((0, 0), (0, 0), (0, Cp - Cin), (0, 0))).reshape(9, Cp, Cout)

    out = pl.pallas_call(
        functools.partial(_conv3x3_kernel, stride=stride, wq=Wq),
        out_shape=jax.ShapeDtypeStruct((N, Lout, Cout), jnp.bfloat16),
        grid_spec=pltpu.PrefetchScalarGridSpec(
            num_scalar_prefetch=0,
            grid=(N,),
            in_specs=[
                pl.BlockSpec((1, P, Lin, Cp), lambda n: (n, 0, 0, 0)),
                pl.BlockSpec((9, Cp, Cout), lambda n: (0, 0, 0)),
                pl.BlockSpec((1, Cout), lambda n: (0, 0)),
                pl.BlockSpec((1, Cout), lambda n: (0, 0)),
            ],
            out_specs=pl.BlockSpec((1, Lout, Cout), lambda n: (n, 0, 0)),
            scratch_shapes=[pltpu.VMEM((Lout, Cout), jnp.float32)],
        ),
        compiler_params=pltpu.CompilerParams(
            dimension_semantics=("parallel",),
            vmem_limit_bytes=VMEM_LIMIT_BYTES,
        ),
    )(phases, wk.astype(jnp.bfloat16),
      scale.reshape(1, Cout).astype(jnp.float32),
      bias.reshape(1, Cout).astype(jnp.float32))

    # Drop the garbage columns produced by the flattened-offset trick.
    return out.reshape(N, Ho, Wq, Cout)[:, :, :Wo, :]


def affine_matmul(x, w, scale, bias, out_dtype=jnp.bfloat16):
    """(x @ w) * scale + bias with (M, N) tiling.  x:[M,K], w:[K,N], scale/bias:[N]."""
    M, K = x.shape
    N = w.shape[1]

    Np = _round_up(N, 128)                       # lane-dense output (e.g. fc2: 10 -> 128)
    if Np != N:
        w = jnp.pad(w, ((0, 0), (0, Np - N)))
        scale = jnp.pad(scale, (0, Np - N))
        bias = jnp.pad(bias, (0, Np - N))
    tn = 512 if Np % 512 == 0 else (256 if Np % 256 == 0 else 128)

    tm = 256 if M >= 256 else _round_up(M, 8)
    Mp = _round_up(M, tm)
    if Mp != M:
        x = jnp.pad(x, ((0, Mp - M), (0, 0)))

    out = pl.pallas_call(
        _affine_matmul_kernel,
        out_shape=jax.ShapeDtypeStruct((Mp, Np), out_dtype),
        grid_spec=pltpu.PrefetchScalarGridSpec(
            num_scalar_prefetch=0,
            grid=(Mp // tm, Np // tn),
            in_specs=[
                pl.BlockSpec((tm, K), lambda i, j: (i, 0)),
                pl.BlockSpec((K, tn), lambda i, j: (0, j)),
                pl.BlockSpec((1, tn), lambda i, j: (0, j)),
                pl.BlockSpec((1, tn), lambda i, j: (0, j)),
            ],
            out_specs=pl.BlockSpec((tm, tn), lambda i, j: (i, j)),
        ),
        compiler_params=pltpu.CompilerParams(
            dimension_semantics=("parallel", "parallel"),
            vmem_limit_bytes=VMEM_LIMIT_BYTES,
        ),
    )(x.astype(jnp.bfloat16), w.astype(jnp.bfloat16),
      scale.reshape(1, Np).astype(jnp.float32),
      bias.reshape(1, Np).astype(jnp.float32))
    return out[:M, :N]


def conv1x1_bn(x, w, scale, bias, stride=1):
    """conv1x1(bias=False) + folded tdBN.  x: [N,H,W,Cin], w: [Cin,Cout]."""
    if stride > 1:
        x = x[:, ::stride, ::stride, :]
    N, H, W, Cin = x.shape
    Cout = w.shape[-1]
    out = affine_matmul(x.reshape(N * H * W, Cin), w, scale, bias,
                        out_dtype=jnp.bfloat16)
    return out.reshape(N, H, W, Cout)


def linear(x, w, b, out_dtype=jnp.bfloat16):
    """nn.Linear: x:[M,Cin], w:[Cin,Cout], b:[Cout]."""
    Cout = w.shape[1]
    return affine_matmul(x, w, jnp.ones((Cout,), jnp.float32), b, out_dtype=out_dtype)


def lif(x_tm, beta, threshold=1.0, residual=None):
    """LIF over time: x_tm [T, M] -> [T, M] bf16 spikes (hidden state reset per call)."""
    T, M = x_tm.shape
    tile = min(32768, _round_up(M, 128))
    Mp = _round_up(M, tile)
    x_p = x_tm if Mp == M else jnp.pad(x_tm, ((0, 0), (0, Mp - M)))
    args = [x_p.astype(jnp.bfloat16)]
    if residual is not None:
        r_p = residual if Mp == M else jnp.pad(residual, ((0, 0), (0, Mp - M)))
        args.append(r_p.astype(jnp.bfloat16))
        kern = functools.partial(_lif_res_kernel, beta=beta, threshold=threshold)
    else:
        kern = functools.partial(_lif_kernel, beta=beta, threshold=threshold)

    spec = pl.BlockSpec((T, tile), lambda i: (0, i))
    out = pl.pallas_call(
        kern,
        out_shape=jax.ShapeDtypeStruct((T, Mp), jnp.bfloat16),
        grid_spec=pltpu.PrefetchScalarGridSpec(
            num_scalar_prefetch=0,
            grid=(Mp // tile,),
            in_specs=[spec] * len(args),
            out_specs=spec,
        ),
        compiler_params=pltpu.CompilerParams(
            dimension_semantics=("parallel",),
            vmem_limit_bytes=VMEM_LIMIT_BYTES,
        ),
    )(*args)
    return out[:, :M]


def global_avg_pool(x_nhwc):
    """AdaptiveAvgPool2d((1,1)): [N,H,W,C] -> [N,C], tiled over N."""
    N, H, W, C = x_nhwc.shape
    tnb = 8
    Npad = _round_up(N, tnb)
    xr = x_nhwc.reshape(N, H * W, C)
    if Npad != N:
        xr = jnp.pad(xr, ((0, Npad - N), (0, 0), (0, 0)))
    out = pl.pallas_call(
        _gap_kernel,
        out_shape=jax.ShapeDtypeStruct((Npad, C), jnp.bfloat16),
        grid_spec=pltpu.PrefetchScalarGridSpec(
            num_scalar_prefetch=0,
            grid=(Npad // tnb,),
            in_specs=[pl.BlockSpec((tnb, H * W, C), lambda i: (i, 0, 0))],
            out_specs=pl.BlockSpec((tnb, C), lambda i: (i, 0)),
        ),
        compiler_params=pltpu.CompilerParams(
            dimension_semantics=("parallel",),
            vmem_limit_bytes=VMEM_LIMIT_BYTES,
        ),
    )(xr.astype(jnp.bfloat16))
    return out[:N]


# ----------------------------------------------------------------------------
# Deterministic parameter initialization
# ----------------------------------------------------------------------------

# TODO(synk): exact TDBatchNorm2d source unavailable; eval-mode tdBN assumed:
#   y = alpha * Vth * gamma * (x - running_mean) / sqrt(running_var + eps) + beta, Vth = 1,
# folded into a per-channel affine (scale, bias) applied in the conv kernel epilogue.
def init_conv_bn(key, kh, kw, cin, cout, alpha):
    k1, k2, k3, k4, k5 = jax.random.split(key, 5)
    fan_in = kh * kw * cin
    w = jax.random.normal(k1, (kh, kw, cin, cout), jnp.float32) / math.sqrt(fan_in)
    gamma = 1.0 + 0.1 * jax.random.normal(k2, (cout,), jnp.float32)
    bn_bias = 0.1 * jax.random.normal(k3, (cout,), jnp.float32)
    r_mean = 0.05 * jax.random.normal(k4, (cout,), jnp.float32)
    r_var = 1.0 + 0.1 * jax.random.uniform(k5, (cout,), jnp.float32)
    eps = 1e-5
    scale = alpha * gamma / jnp.sqrt(r_var + eps)
    bias = bn_bias - r_mean * scale
    return w, scale, bias


def init_params(key, in_channels, num_classes):
    keys = iter(jax.random.split(key, 64))
    alpha2 = 1.0 / math.sqrt(2.0)
    p = {}
    p["stem"] = init_conv_bn(next(keys), 3, 3, in_channels, 128, alpha=1.0)
    start = 128
    stages = [("block1", 3, 128), ("block2", 3, 256), ("block3", 2, 512)]
    for name, nblk, cout in stages:
        blocks = []
        for _ in range(nblk):
            cin = start
            stride = 2 if cin != cout else 1
            w1, s1, b1 = init_conv_bn(next(keys), 3, 3, cin, cout, alpha=1.0)
            w2, s2, b2 = init_conv_bn(next(keys), 3, 3, cout, cout, alpha=alpha2)
            shortcut = None
            if stride != 1 or cin != cout:
                ws, ss, bs = init_conv_bn(next(keys), 1, 1, cin, cout, alpha=alpha2)
                shortcut = (ws.reshape(cin, cout), ss, bs)
            blocks.append({"conv1": (w1, s1, b1, stride),
                           "conv2": (w2, s2, b2),
                           "shortcut": shortcut})
            start = cout
        p[name] = blocks
    k1, k2, k3, k4 = jax.random.split(next(keys), 4)
    p["fc1"] = (jax.random.normal(k1, (512, 256), jnp.float32) / math.sqrt(512.0),
                0.1 * jax.random.normal(k2, (256,), jnp.float32))
    p["fc2"] = (jax.random.normal(k3, (256, num_classes), jnp.float32) / math.sqrt(256.0),
                0.1 * jax.random.normal(k4, (num_classes,), jnp.float32))
    return p


# ----------------------------------------------------------------------------
# SResNet19 forward pass
# ----------------------------------------------------------------------------

def sresnet19_forward(x_tbchw, params, beta, num_classes, training=False):
    # TODO(synk): learnable LIF beta/threshold are treated as fixed scalars (forward only).
    T, B, C, H, W = x_tbchw.shape
    # [T, B, C, H, W] -> NHWC with time folded into batch: [T*B, H, W, C]
    x = jnp.transpose(x_tbchw, (0, 1, 3, 4, 2)).reshape(T * B, H, W, C)

    def lif_act(x_nhwc, residual=None):
        N, h, w, c = x_nhwc.shape
        xt = x_nhwc.reshape(T, B * h * w * c)
        rt = None if residual is None else residual.reshape(T, B * h * w * c)
        spikes = lif(xt, beta, residual=rt)
        return spikes.reshape(N, h, w, c)

    # stem + lif1
    w_, s_, b_ = params["stem"]
    x = conv3x3_bn(x, w_, s_, b_, stride=1)
    x = lif_act(x)

    # residual stages
    for stage in ("block1", "block2", "block3"):
        for blk in params[stage]:
            identity = x
            w1, s1, b1, stride = blk["conv1"]
            x = conv3x3_bn(x, w1, s1, b1, stride=stride)
            x = lif_act(x)
            w2, s2, b2 = blk["conv2"]
            x = conv3x3_bn(x, w2, s2, b2, stride=1)
            if blk["shortcut"] is not None:
                ws, ss, bs = blk["shortcut"]
                identity = conv1x1_bn(identity, ws, ss, bs, stride=stride)
            # residual add is fused into the LIF kernel (one fewer HBM round trip)
            x = lif_act(x, residual=identity)

    # global average pool -> [T*B, 512]
    x = global_avg_pool(x)
    # fc1 -> lif2 -> fc2
    w_, b_ = params["fc1"]
    x = linear(x, w_, b_, out_dtype=jnp.bfloat16)              # [T*B, 256]
    x = lif(x.reshape(T, B * 256), beta).reshape(T * B, 256)
    w_, b_ = params["fc2"]
    x = linear(x, w_, b_, out_dtype=jnp.float32)               # [T*B, K]
    x = x.reshape(T, B, num_classes).astype(jnp.float32)
    if training:
        return x
    return jnp.mean(x, axis=0)                                 # eval mode: mean over time


# ----------------------------------------------------------------------------
# Demo
# ----------------------------------------------------------------------------

if __name__ == "__main__":
    T, B, IN_CH, H, W = 2, 2, 3, 8, 8
    NUM_CLASSES = 10
    BETA = 0.5

    key = jax.random.PRNGKey(0)
    kp, kx = jax.random.split(key)
    params = init_params(kp, IN_CH, NUM_CLASSES)
    x = jax.random.normal(kx, (T, B, IN_CH, H, W), jnp.float32)

    out = sresnet19_forward(x, params, beta=BETA, num_classes=NUM_CLASSES)
    out = jax.block_until_ready(out)

    assert out.shape == (B, NUM_CLASSES), out.shape
    assert bool(jnp.all(jnp.isfinite(out)))
    print("KERNEL_OK")
</pallas_src>

<mosaic_0001>
module attributes {stable_mosaic.version = 11 : i64} {
  func.func @_conv3x3_kernel(%arg0: i32, %arg1: memref<1x1x110x128xbf16, #tpu.memory_space<vmem>>, %arg2: memref<9x128x128xbf16, #tpu.memory_space<vmem>>, %arg3: memref<1x128xf32, #tpu.memory_space<vmem>>, %arg4: memref<1x128xf32, #tpu.memory_space<vmem>>, %arg5: memref<1x80x128xbf16, #tpu.memory_space<vmem>>, %arg6: memref<80x128xf32, #tpu.memory_space<vmem>>) attributes {dimension_semantics = [#tpu.dimension_semantics<parallel>], iteration_bounds = array<i64: 4>, scalar_prefetch = 0 : i64, scratch_operands = 1 : i64, tpu.core_type = #tpu.core_type<tc>, window_params = [{transform_indices = @transform_0, window_bounds = array<i64: 1, 1, 110, 128>}, {pipeline_mode = #tpu.pipeline_mode<synchronous>, transform_indices = @transform_1, window_bounds = array<i64: 9, 128, 128>}, {pipeline_mode = #tpu.pipeline_mode<synchronous>, transform_indices = @transform_2, window_bounds = array<i64: 1, 128>}, {pipeline_mode = #tpu.pipeline_mode<synchronous>, transform_indices = @transform_3, window_bounds = array<i64: 1, 128>}, {transform_indices = @transform_4, window_bounds = array<i64: 1, 80, 128>}]} {
    %c0 = arith.constant 0 : index
    %c0_0 = arith.constant 0 : index
    %c0_1 = arith.constant 0 : index
    %c0_2 = arith.constant 0 : index
    %0 = vector.load %arg1[%c0, %c0_0, %c0_1, %c0_2] : memref<1x1x110x128xbf16, #tpu.memory_space<vmem>>, vector<1x1x80x128xbf16>
    %1 = vector.shape_cast %0 : vector<1x1x80x128xbf16> to vector<80x128xbf16>
    %c0_3 = arith.constant 0 : index
    %c0_4 = arith.constant 0 : index
    %c0_5 = arith.constant 0 : index
    %2 = vector.load %arg2[%c0_3, %c0_4, %c0_5] : memref<9x128x128xbf16, #tpu.memory_space<vmem>>, vector<1x128x128xbf16>
    %3 = vector.shape_cast %2 : vector<1x128x128xbf16> to vector<128x128xbf16>
    %cst = arith.constant dense<0.000000e+00> : vector<80x128xf32>
    %4 = tpu.matmul %1, %3, %cst {dimension_numbers = #tpu.dot_dimension_numbers<[1], [0], [0], [1], [0, 0, 1, 1], [], []>} : vector<80x128xbf16>, vector<128x128xbf16>, vector<80x128xf32> -> vector<80x128xf32>
    %c0_6 = arith.constant 0 : index
    %c0_7 = arith.constant 0 : index
    %5 = vector.load %arg6[%c0_6, %c0_7] : memref<80x128xf32, #tpu.memory_space<vmem>>, vector<80x128xf32>
    tpu.vector_store %arg6[%c0_6, %c0_7], %4 {strides = array<i32>} : memref<80x128xf32, #tpu.memory_space<vmem>>, vector<80x128xf32>,
    %c0_8 = arith.constant 0 : index
    %c0_9 = arith.constant 0 : index
    %c1 = arith.constant 1 : index
    %c0_10 = arith.constant 0 : index
    %6 = vector.load %arg1[%c0_8, %c0_9, %c1, %c0_10] : memref<1x1x110x128xbf16, #tpu.memory_space<vmem>>, vector<1x1x80x128xbf16>
    %7 = vector.shape_cast %6 : vector<1x1x80x128xbf16> to vector<80x128xbf16>
    %c1_11 = arith.constant 1 : index
    %c0_12 = arith.constant 0 : index
    %c0_13 = arith.constant 0 : index
    %8 = vector.load %arg2[%c1_11, %c0_12, %c0_13] : memref<9x128x128xbf16, #tpu.memory_space<vmem>>, vector<1x128x128xbf16>
    %9 = vector.shape_cast %8 : vector<1x128x128xbf16> to vector<128x128xbf16>
    %cst_14 = arith.constant dense<0.000000e+00> : vector<80x128xf32>
    %10 = tpu.matmul %7, %9, %cst_14 {dimension_numbers = #tpu.dot_dimension_numbers<[1], [0], [0], [1], [0, 0, 1, 1], [], []>} : vector<80x128xbf16>, vector<128x128xbf16>, vector<80x128xf32> -> vector<80x128xf32>
    %c0_15 = arith.constant 0 : index
    %c0_16 = arith.constant 0 : index
    %11 = vector.load %arg6[%c0_15, %c0_16] : memref<80x128xf32, #tpu.memory_space<vmem>>, vector<80x128xf32>
    %12 = arith.addf %11, %10 : vector<80x128xf32>
    %c0_17 = arith.constant 0 : index
    %c0_18 = arith.constant 0 : index
    %13 = vector.load %arg6[%c0_17, %c0_18] : memref<80x128xf32, #tpu.memory_space<vmem>>, vector<80x128xf32>
    tpu.vector_store %arg6[%c0_17, %c0_18], %12 {strides = array<i32>} : memref<80x128xf32, #tpu.memory_space<vmem>>, vector<80x128xf32>,
    %c0_19 = arith.constant 0 : index
    %c0_20 = arith.constant 0 : index
    %c2 = arith.constant 2 : index
    %c0_21 = arith.constant 0 : index
    %14 = vector.load %arg1[%c0_19, %c0_20, %c2, %c0_21] : memref<1x1x110x128xbf16, #tpu.memory_space<vmem>>, vector<1x1x80x128xbf16>
    %15 = vector.shape_cast %14 : vector<1x1x80x128xbf16> to vector<80x128xbf16>
    %c2_22 = arith.constant 2 : index
    %c0_23 = arith.constant 0 : index
    %c0_24 = arith.constant 0 : index
    %16 = vector.load %arg2[%c2_22, %c0_23, %c0_24] : memref<9x128x128xbf16, #tpu.memory_space<vmem>>, vector<1x128x128xbf16>
    %17 = vector.shape_cast %16 : vector<1x128x128xbf16> to vector<128x128xbf16>
    %cst_25 = arith.constant dense<0.000000e+00> : vector<80x128xf32>
    %18 = tpu.matmul %15, %17, %cst_25 {dimension_numbers = #tpu.dot_dimension_numbers<[1], [0], [0], [1], [0, 0, 1, 1], [], []>} : vector<80x128xbf16>, vector<128x128xbf16>, vector<80x128xf32> -> vector<80x128xf32>
    %c0_26 = arith.constant 0 : index
    %c0_27 = arith.constant 0 : index
    %19 = vector.load %arg6[%c0_26, %c0_27] : memref<80x128xf32, #tpu.memory_space<vmem>>, vector<80x128xf32>
    %20 = arith.addf %19, %18 : vector<80x128xf32>
    %c0_28 = arith.constant 0 : index
    %c0_29 = arith.constant 0 : index
    %21 = vector.load %arg6[%c0_28, %c0_29] : memref<80x128xf32, #tpu.memory_space<vmem>>, vector<80x128xf32>
    tpu.vector_store %arg6[%c0_28, %c0_29], %20 {strides = array<i32>} : memref<80x128xf32, #tpu.memory_space<vmem>>, vector<80x128xf32>,
    %c0_30 = arith.constant 0 : index
    %c0_31 = arith.constant 0 : index
    %c10 = arith.constant 10 : index
    %c0_32 = arith.constant 0 : index
    %22 = vector.load %arg1[%c0_30, %c0_31, %c10, %c0_32] : memref<1x1x110x128xbf16, #tpu.memory_space<vmem>>, vector<1x1x80x128xbf16>
    %23 = vector.shape_cast %22 : vector<1x1x80x128xbf16> to vector<80x128xbf16>
    %c3 = arith.constant 3 : index
    %c0_33 = arith.constant 0 : index
    %c0_34 = arith.constant 0 : index
    %24 = vector.load %arg2[%c3, %c0_33, %c0_34] : memref<9x128x128xbf16, #tpu.memory_space<vmem>>, vector<1x128x128xbf16>
    %25 = vector.shape_cast %24 : vector<1x128x128xbf16> to vector<128x128xbf16>
    %cst_35 = arith.constant dense<0.000000e+00> : vector<80x128xf32>
    %26 = tpu.matmul %23, %25, %cst_35 {dimension_numbers = #tpu.dot_dimension_numbers<[1], [0], [0], [1], [0, 0, 1, 1], [], []>} : vector<80x128xbf16>, vector<128x128xbf16>, vector<80x128xf32> -> vector<80x128xf32>
    %c0_36 = arith.constant 0 : index
    %c0_37 = arith.constant 0 : index
    %27 = vector.load %arg6[%c0_36, %c0_37] : memref<80x128xf32, #tpu.memory_space<vmem>>, vector<80x128xf32>
    %28 = arith.addf %27, %26 : vector<80x128xf32>
    %c0_38 = arith.constant 0 : index
    %c0_39 = arith.constant 0 : index
    %29 = vector.load %arg6[%c0_38, %c0_39] : memref<80x128xf32, #tpu.memory_space<vmem>>, vector<80x128xf32>
    tpu.vector_store %arg6[%c0_38, %c0_39], %28 {strides = array<i32>} : memref<80x128xf32, #tpu.memory_space<vmem>>, vector<80x128xf32>,
    %c0_40 = arith.constant 0 : index
    %c0_41 = arith.constant 0 : index
    %c11 = arith.constant 11 : index
    %c0_42 = arith.constant 0 : index
    %30 = vector.load %arg1[%c0_40, %c0_41, %c11, %c0_42] : memref<1x1x110x128xbf16, #tpu.memory_space<vmem>>, vector<1x1x80x128xbf16>
    %31 = vector.shape_cast %30 : vector<1x1x80x128xbf16> to vector<80x128xbf16>
    %c4 = arith.constant 4 : index
    %c0_43 = arith.constant 0 : index
    %c0_44 = arith.constant 0 : index
    %32 = vector.load %arg2[%c4, %c0_43, %c0_44] : memref<9x128x128xbf16, #tpu.memory_space<vmem>>, vector<1x128x128xbf16>
    %33 = vector.shape_cast %32 : vector<1x128x128xbf16> to vector<128x128xbf16>
    %cst_45 = arith.constant dense<0.000000e+00> : vector<80x128xf32>
    %34 = tpu.matmul %31, %33, %cst_45 {dimension_numbers = #tpu.dot_dimension_numbers<[1], [0], [0], [1], [0, 0, 1, 1], [], []>} : vector<80x128xbf16>, vector<128x128xbf16>, vector<80x128xf32> -> vector<80x128xf32>
    %c0_46 = arith.constant 0 : index
    %c0_47 = arith.constant 0 : index
    %35 = vector.load %arg6[%c0_46, %c0_47] : memref<80x128xf32, #tpu.memory_space<vmem>>, vector<80x128xf32>
    %36 = arith.addf %35, %34 : vector<80x128xf32>
    %c0_48 = arith.constant 0 : index
    %c0_49 = arith.constant 0 : index
    %37 = vector.load %arg6[%c0_48, %c0_49] : memref<80x128xf32, #tpu.memory_space<vmem>>, vector<80x128xf32>
    tpu.vector_store %arg6[%c0_48, %c0_49], %36 {strides = array<i32>} : memref<80x128xf32, #tpu.memory_space<vmem>>, vector<80x128xf32>,
    %c0_50 = arith.constant 0 : index
    %c0_51 = arith.constant 0 : index
    %c12 = arith.constant 12 : index
    %c0_52 = arith.constant 0 : index
    %38 = vector.load %arg1[%c0_50, %c0_51, %c12, %c0_52] : memref<1x1x110x128xbf16, #tpu.memory_space<vmem>>, vector<1x1x80x128xbf16>
    %39 = vector.shape_cast %38 : vector<1x1x80x128xbf16> to vector<80x128xbf16>
    %c5 = arith.constant 5 : index
    %c0_53 = arith.constant 0 : index
    %c0_54 = arith.constant 0 : index
    %40 = vector.load %arg2[%c5, %c0_53, %c0_54] : memref<9x128x128xbf16, #tpu.memory_space<vmem>>, vector<1x128x128xbf16>
    %41 = vector.shape_cast %40 : vector<1x128x128xbf16> to vector<128x128xbf16>
    %cst_55 = arith.constant dense<0.000000e+00> : vector<80x128xf32>
    %42 = tpu.matmul %39, %41, %cst_55 {dimension_numbers = #tpu.dot_dimension_numbers<[1], [0], [0], [1], [0, 0, 1, 1], [], []>} : vector<80x128xbf16>, vector<128x128xbf16>, vector<80x128xf32> -> vector<80x128xf32>
    %c0_56 = arith.constant 0 : index
    %c0_57 = arith.constant 0 : index
    %43 = vector.load %arg6[%c0_56, %c0_57] : memref<80x128xf32, #tpu.memory_space<vmem>>, vector<80x128xf32>
    %44 = arith.addf %43, %42 : vector<80x128xf32>
    %c0_58 = arith.constant 0 : index
    %c0_59 = arith.constant 0 : index
    %45 = vector.load %arg6[%c0_58, %c0_59] : memref<80x128xf32, #tpu.memory_space<vmem>>, vector<80x128xf32>
    tpu.vector_store %arg6[%c0_58, %c0_59], %44 {strides = array<i32>} : memref<80x128xf32, #tpu.memory_space<vmem>>, vector<80x128xf32>,
    %c0_60 = arith.constant 0 : index
    %c0_61 = arith.constant 0 : index
    %c20 = arith.constant 20 : index
    %c0_62 = arith.constant 0 : index
    %46 = vector.load %arg1[%c0_60, %c0_61, %c20, %c0_62] : memref<1x1x110x128xbf16, #tpu.memory_space<vmem>>, vector<1x1x80x128xbf16>
    %47 = vector.shape_cast %46 : vector<1x1x80x128xbf16> to vector<80x128xbf16>
    %c6 = arith.constant 6 : index
    %c0_63 = arith.constant 0 : index
    %c0_64 = arith.constant 0 : index
    %48 = vector.load %arg2[%c6, %c0_63, %c0_64] : memref<9x128x128xbf16, #tpu.memory_space<vmem>>, vector<1x128x128xbf16>
    %49 = vector.shape_cast %48 : vector<1x128x128xbf16> to vector<128x128xbf16>
    %cst_65 = arith.constant dense<0.000000e+00> : vector<80x128xf32>
    %50 = tpu.matmul %47, %49, %cst_65 {dimension_numbers = #tpu.dot_dimension_numbers<[1], [0], [0], [1], [0, 0, 1, 1], [], []>} : vector<80x128xbf16>, vector<128x128xbf16>, vector<80x128xf32> -> vector<80x128xf32>
    %c0_66 = arith.constant 0 : index
    %c0_67 = arith.constant 0 : index
    %51 = vector.load %arg6[%c0_66, %c0_67] : memref<80x128xf32, #tpu.memory_space<vmem>>, vector<80x128xf32>
    %52 = arith.addf %51, %50 : vector<80x128xf32>
    %c0_68 = arith.constant 0 : index
    %c0_69 = arith.constant 0 : index
    %53 = vector.load %arg6[%c0_68, %c0_69] : memref<80x128xf32, #tpu.memory_space<vmem>>, vector<80x128xf32>
    tpu.vector_store %arg6[%c0_68, %c0_69], %52 {strides = array<i32>} : memref<80x128xf32, #tpu.memory_space<vmem>>, vector<80x128xf32>,
    %c0_70 = arith.constant 0 : index
    %c0_71 = arith.constant 0 : index
    %c21 = arith.constant 21 : index
    %c0_72 = arith.constant 0 : index
    %54 = vector.load %arg1[%c0_70, %c0_71, %c21, %c0_72] : memref<1x1x110x128xbf16, #tpu.memory_space<vmem>>, vector<1x1x80x128xbf16>
    %55 = vector.shape_cast %54 : vector<1x1x80x128xbf16> to vector<80x128xbf16>
    %c7 = arith.constant 7 : index
    %c0_73 = arith.constant 0 : index
    %c0_74 = arith.constant 0 : index
    %56 = vector.load %arg2[%c7, %c0_73, %c0_74] : memref<9x128x128xbf16, #tpu.memory_space<vmem>>, vector<1x128x128xbf16>
    %57 = vector.shape_cast %56 : vector<1x128x128xbf16> to vector<128x128xbf16>
    %cst_75 = arith.constant dense<0.000000e+00> : vector<80x128xf32>
    %58 = tpu.matmul %55, %57, %cst_75 {dimension_numbers = #tpu.dot_dimension_numbers<[1], [0], [0], [1], [0, 0, 1, 1], [], []>} : vector<80x128xbf16>, vector<128x128xbf16>, vector<80x128xf32> -> vector<80x128xf32>
    %c0_76 = arith.constant 0 : index
    %c0_77 = arith.constant 0 : index
    %59 = vector.load %arg6[%c0_76, %c0_77] : memref<80x128xf32, #tpu.memory_space<vmem>>, vector<80x128xf32>
    %60 = arith.addf %59, %58 : vector<80x128xf32>
    %c0_78 = arith.constant 0 : index
    %c0_79 = arith.constant 0 : index
    %61 = vector.load %arg6[%c0_78, %c0_79] : memref<80x128xf32, #tpu.memory_space<vmem>>, vector<80x128xf32>
    tpu.vector_store %arg6[%c0_78, %c0_79], %60 {strides = array<i32>} : memref<80x128xf32, #tpu.memory_space<vmem>>, vector<80x128xf32>,
    %c0_80 = arith.constant 0 : index
    %c0_81 = arith.constant 0 : index
    %c22 = arith.constant 22 : index
    %c0_82 = arith.constant 0 : index
    %62 = vector.load %arg1[%c0_80, %c0_81, %c22, %c0_82] : memref<1x1x110x128xbf16, #tpu.memory_space<vmem>>, vector<1x1x80x128xbf16>
    %63 = vector.shape_cast %62 : vector<1x1x80x128xbf16> to vector<80x128xbf16>
    %c8 = arith.constant 8 : index
    %c0_83 = arith.constant 0 : index
    %c0_84 = arith.constant 0 : index
    %64 = vector.load %arg2[%c8, %c0_83, %c0_84] : memref<9x128x128xbf16, #tpu.memory_space<vmem>>, vector<1x128x128xbf16>
    %65 = vector.shape_cast %64 : vector<1x128x128xbf16> to vector<128x128xbf16>
    %cst_85 = arith.constant dense<0.000000e+00> : vector<80x128xf32>
    %66 = tpu.matmul %63, %65, %cst_85 {dimension_numbers = #tpu.dot_dimension_numbers<[1], [0], [0], [1], [0, 0, 1, 1], [], []>} : vector<80x128xbf16>, vector<128x128xbf16>, vector<80x128xf32> -> vector<80x128xf32>
    %c0_86 = arith.constant 0 : index
    %c0_87 = arith.constant 0 : index
    %67 = vector.load %arg6[%c0_86, %c0_87] : memref<80x128xf32, #tpu.memory_space<vmem>>, vector<80x128xf32>
    %68 = arith.addf %67, %66 : vector<80x128xf32>
    %c0_88 = arith.constant 0 : index
    %c0_89 = arith.constant 0 : index
    %69 = vector.load %arg6[%c0_88, %c0_89] : memref<80x128xf32, #tpu.memory_space<vmem>>, vector<80x128xf32>
    tpu.vector_store %arg6[%c0_88, %c0_89], %68 {strides = array<i32>} : memref<80x128xf32, #tpu.memory_space<vmem>>, vector<80x128xf32>,
    %c0_90 = arith.constant 0 : index
    %c0_91 = arith.constant 0 : index
    %70 = vector.load %arg6[%c0_90, %c0_91] : memref<80x128xf32, #tpu.memory_space<vmem>>, vector<80x128xf32>
    %c0_92 = arith.constant 0 : index
    %c0_93 = arith.constant 0 : index
    %71 = vector.load %arg3[%c0_92, %c0_93] : memref<1x128xf32, #tpu.memory_space<vmem>>, vector<1x128xf32>
    %72 = vector.broadcast %71 : vector<1x128xf32> to vector<80x128xf32>
    %73 = arith.mulf %70, %72 : vector<80x128xf32>
    %c0_94 = arith.constant 0 : index
    %c0_95 = arith.constant 0 : index
    %74 = vector.load %arg4[%c0_94, %c0_95] : memref<1x128xf32, #tpu.memory_space<vmem>>, vector<1x128xf32>
    %75 = vector.broadcast %74 : vector<1x128xf32> to vector<80x128xf32>
    %76 = arith.addf %73, %75 : vector<80x128xf32>
    %77 = arith.truncf %76 : vector<80x128xf32> to vector<80x128xbf16>
    %c0_96 = arith.constant 0 : index
    %c0_97 = arith.constant 0 : index
    %c0_98 = arith.constant 0 : index
    %78 = vector.load %arg5[%c0_96, %c0_97, %c0_98] : memref<1x80x128xbf16, #tpu.memory_space<vmem>>, vector<1x80x128xbf16>
    %79 = vector.shape_cast %78 : vector<1x80x128xbf16> to vector<80x128xbf16>
    %80 = vector.shape_cast %77 : vector<80x128xbf16> to vector<1x80x128xbf16>
    tpu.vector_store %arg5[%c0_96, %c0_97, %c0_98], %80 {strides = array<i32>} : memref<1x80x128xbf16, #tpu.memory_space<vmem>>, vector<1x80x128xbf16>,
    return
  }
  func.func @transform_0(%arg0: i32) -> (i32, i32, i32, i32) {
    %c0_i32 = arith.constant 0 : i32
    %c0_i32_0 = arith.constant 0 : i32
    %c0_i32_1 = arith.constant 0 : i32
    %c0_i32_2 = arith.constant 0 : i32
    return %arg0, %c0_i32, %c0_i32_0, %c0_i32_1 : i32, i32, i32, i32
  }
  func.func @transform_1(%arg0: i32) -> (i32, i32, i32) {
    %c0_i32 = arith.constant 0 : i32
    %c0_i32_0 = arith.constant 0 : i32
    %c0_i32_1 = arith.constant 0 : i32
    %c0_i32_2 = arith.constant 0 : i32
    return %c0_i32, %c0_i32_0, %c0_i32_1 : i32, i32, i32
  }
  func.func @transform_2(%arg0: i32) -> (i32, i32) {
    %c0_i32 = arith.constant 0 : i32
    %c0_i32_0 = arith.constant 0 : i32
    %c0_i32_1 = arith.constant 0 : i32
    return %c0_i32, %c0_i32_0 : i32, i32
  }
  func.func @transform_3(%arg0: i32) -> (i32, i32) {
    %c0_i32 = arith.constant 0 : i32
    %c0_i32_0 = arith.constant 0 : i32
    %c0_i32_1 = arith.constant 0 : i32
    return %c0_i32, %c0_i32_0 : i32, i32
  }
  func.func @transform_4(%arg0: i32) -> (i32, i32, i32) {
    %c0_i32 = arith.constant 0 : i32
    %c0_i32_0 = arith.constant 0 : i32
    %c0_i32_1 = arith.constant 0 : i32
    return %arg0, %c0_i32, %c0_i32_0 : i32, i32, i32
  }
}

</mosaic_0001>

<bundles_post_ra>
// kernel: tpu_custom_call.1
= control target key start
LH: loop header
LB: loop body
LE: loop exit
PB: predicated region body
PF: predicated region fallthrough
CT: control target
= control target key end

     0   :  { %9 = vsyncpa [#allocation4], 0  ;;  %s3267_s0 = inlined_call_operand.vmem [shape: bf16[4,1,110,128], index: 0, kind: input, shape index: {}]   ;;  %s3268_s1 = inlined_call_operand.hbm [shape: bf16[9,128,128], index: 1, kind: input, shape index: {}]   ;;  %s3269_s2 = inlined_call_operand.vmem [shape: f32[1,128], index: 2, kind: input, shape index: {}]   ;;  %s3270_s3 = inlined_call_operand.vmem [shape: f32[1,128], index: 3, kind: input, shape index: {}]   ;;  %s3271_s4 = inlined_call_operand.hbm [shape: bf16[4,80,128], index: 4, kind: output, shape index: {}]  }
   0x1   :  { %10 = vsyncpa [#allocation5], 0 }
   0x2   :  { %12 = vsyncpa [#allocation5 + $0x1], 0  ;;  %s2931_s15 = smov 0   ;;  %s2933_s16 = smov 0  }
   0x3   :  { %s2935_s17 = smov 0   ;;  %s2937_s18 = smov 0  }
   0x4 LB: > { %s2952_s19 = sadd.s32 4294967295, %s2899_s18   ;;  %s2104_s20 = sadd.s32 4294967294, %s2899_s18   ;;  %s2899_s18 = sphi %s2937_s18, %s3277_s18   ;;  %s2895_s17 = sphi %s2935_s17, %s3276_s17   ;;  %s2891_s16 = sphi %s2933_s16, %s3275_s16   ;;  %s2887_s15 = sphi %s2931_s15, %s3274_s15  }
   0x5   : > { %s2956_s21 = sadd.s32 1, %s2899_s18   ;;  %s114_s22 = sadd.s32 1, %s2895_s17 }
   0x6   : > { %s111_s23 = ssub.s32 %s2899_s18, %s2956_s21  ;;  %p124_p0 = scmp.ne.s32.totalorder %s2895_s17, %s2891_s16 }
   0x7   : > { %p112_p1 = scmp.eq.s32.totalorder %s111_s23, 0  ;;  %p125_p2 = scmp.eq.s32.totalorder %s2952_s19, 3 }
   0x8   : > { %p130_p3 = scmp.ne.s32.totalorder %s2891_s16, %s2887_s15  ;;  %p131_p4 = scmp.eq.s32.totalorder %s2104_s20, 3 }
   0x9   : > { %s2967_s24 = scalar_select %p112_p1, %s2895_s17, %s114_s22  }
   0xa   : > { %p2969_p5 = por %p125_p2, %p124_p0  ;;  %p2973_p6 = por %p131_p4, %p130_p3 }
   0xb   : > { %p2105_p7 = scmp.ge.s32.totalorder %s2899_s18, 1  ;;  %p138_p8 = scmp.lt.s32.totalorder %s2899_s18, 5 }
   0xc   : > { %p2761_p9 = scmp.eq.s32.totalorder %s2952_s19, 0  ;;  %s149_s29 = sshll.u32 %s3268_s1, 4  ;;  %s150_s29 = int_to_ptr.hbm [resolvable:$true] %s149_s29 }
   0xd   : > { %p139_p10 = pnand %p2105_p7, %p138_p8  ;;  %s2901_s30 = smov [#allocation3]  }
   0xe   : > { %s151_s5 = sshll.u32 %s2901_s30, 4  ;;  %s2902_s6 = smov 64   ;;  %s152_s5 = int_to_ptr.vmem [resolvable:$true] %s151_s5 }
   0xf   : > { %p2753_p11 = pneg %p139_p10  ;;  %s2903_s7 = smov 4  }
  0x10   : > { %181 = sbr.rel (%p139_p10) target bundleno = 389 (0x185), region = 36 }
  0x11   : > { %p2754_p12 = pnand %p2761_p9, %p2753_p11 }
  0x13   : > { %2756 = dma.hbm_to_vmem [thread:$0]  (!%p2754_p12), %s150_s29, 9216, %s152_s5, [#allocation4], %s2902_s6, %s2902_s6, %s2903_s7  }
  0x15   : > { %2878 = dma.done.wait (%p2761_p9), [#allocation4], 9216  }
  0x16   : > { %2880 = vsyncadd (%p2761_p9), [#allocation4], 4294958080  ;;  %v2594_v0 = vld [vmem:[#allocation3 + $0x38] sm:$0xff]  ;;  %v2593_v1 = vld [vmem:[#allocation3 + $0x30] sm:$0xff]  ;;  %p208_p13 = scmp.lt.s32.totalorder %s2952_s19, 3  ;;  %vm635_vm0 = vcmask 1046528  }
  0x17   : > { %317 = vmatpush.bf16.msra.mxu0 %v2594_v0  ;;  %2728 = vmatpush.bf16.msra.mxu1 %v2594_v0  ;;  %v2633_v2 = vld [vmem:[#allocation3 + $0xf8] sm:$0xff]  ;;  %v2632_v3 = vld [vmem:[#allocation3 + $0xf0] sm:$0xff]  ;;  %v2592_v4 = vld [vmem:[#allocation3 + $0x28] sm:$0xff]  ;;  %vm417_vm1 = vsmask.f32 7424  ;;  %vm1231_vm4 = vcmask 1045504  }
  0x18   : > { %2729 = vmatpush.bf16.msra.mxu2 %v2594_v0  ;;  %884 = vmatpush.bf16.msra.mxu3 %v2633_v2  ;;  %v2631_v5 = vld [vmem:[#allocation3 + $0xe8] sm:$0xff]  ;;  %v2591_v6 = vld [vmem:[#allocation3 + $0x20] sm:$0xff]  ;;  %v2590_v8 = vld [vmem:[#allocation3 + $0x18] sm:$0xff]  ;;  %s209_s8 = scalar_select %p208_p13, %s2952_s19, 3  ;;  %vm1004_vm2 = vsmask.f32 6400 }
  0x19   : > { %v2630_v7 = vld [vmem:[#allocation3 + $0xe0] sm:$0xff]  ;;  %v2629_v9 = vld [vmem:[#allocation3 + $0xd8] sm:$0xff]  ;;  %v2589_v10 = vld [vmem:[#allocation3 + $0x10] sm:$0xff]  ;;  %vm1600_vm3 = vsmask.f32 5376  ;;  %vm1827_vm5 = vcmask 1044480  }
  0x1a   : > { %s2745_s9 = smul.u32 56, %s209_s8  ;;  %v2628_v11 = vld [vmem:[#allocation3 + $0xd0] sm:$0xff]  ;;  %v2588_v12 = vld [vmem:[#allocation3 + $0x8] sm:$0xff]  ;;  %v2587_v16 = vld [vmem:[#allocation3] sm:$0xff]  ;;  %s205_s20 = sand.u32 1, %s2891_s16  }
  0x1b   : > { %318 = vmatpush.bf16.msra.mxu0 %v2593_v1  ;;  %2730 = vmatpush.bf16.msra.mxu1 %v2593_v1  ;;  %v2627_v15 = vld [vmem:[#allocation3 + $0xc8] sm:$0xff]  ;;  %v2607_v19 = vld [vmem:[#allocation3 + $0x78] sm:$0xff]  ;;  %v2626_v25 = vld [vmem:[#allocation3 + $0xc0] sm:$0xff]  ;;  %s2744_s27 = smul.u32 40, %s205_s20  ;;  %s2853_s13 = scalar_lea.hbm %s3271_s4, 160 }
  0x1c   : > { %2731 = vmatpush.bf16.msra.mxu2 %v2593_v1  ;;  %885 = vmatpush.bf16.msra.mxu3 %v2632_v3  ;;  %s2994_s12 = scalar_lea.vmem %s3267_s0, %s2745_s9  ;;  %v2620_v20 = vld [vmem:[#allocation3 + $0xb8] sm:$0xff]  ;;  %v2606_v28 = vld [vmem:[#allocation3 + $0x70] sm:$0xff]  ;;  %v2605_v33 = vld [vmem:[#allocation3 + $0x68] sm:$0xff]  ;;  %s2746_s29 = smul.u32 40, %s2952_s19 }
  0x1d   : > { %v2269_v13 = vld [vmem:[%s2994_s12 + $0x4] sm:$0xe]  ;;  %v2621_v14 = vld [vmem:[%s2994_s12 + $0x4] sm:$0xf0]  ;;  %v2999_v17 = vld [vmem:[%s2994_s12 + $0xc] sm:$0xff]  ;;  %s3203_s28 = scalar_lea.vmem [#allocation6], %s2744_s27 }
  0x1e   : > { %v2270_v18 = vor.u32 %v2621_v14, %v2269_v13  ;;  %v2646_v21 = vld [vmem:[#allocation3 + $0x138] sm:$0xff]  ;;  %v2582_v22 = vld [vmem:[%s2994_s12] sm:$0xff]  ;;  %v2584_v23 = vld [vmem:[%s2994_s12 + $0x10] sm:$0xff]  ;;  %v821_v27 = vrot.slane %v2999_v17, 1  ;;  %s2026_s6 = scalar_lea.hbm %s3271_s4, %s2746_s29  ;;  %s2027_s7 = sshll.u32 %s3203_s28, 4  ;;  %s2028_s7 = int_to_ptr.vmem [resolvable:$true] %s2027_s7 }
  0x1f   : > { %319 = vmatpush.bf16.msra.mxu0 %v2592_v4  ;;  %2732 = vmatpush.bf16.msra.mxu1 %v2592_v4  ;;  %v2586_v24 = vld [vmem:[%s2994_s12 + $0x20] sm:$0xff]  ;;  %v2685_v29 = vld [vmem:[#allocation3 + $0x1f8] sm:$0xff]  ;;  %v2619_v30 = vld [vmem:[#allocation3 + $0xb0] sm:$0xff]  ;;  %s2029_s8 = sshll.u32 %s2026_s6, 4  ;;  %s2015_s19 = scalar_lea.sflag [#allocation5], %s205_s20  ;;  %s2030_s8 = int_to_ptr.hbm [resolvable:$true] %s2029_s8 }
  0x20   : > { %2733 = vmatpush.bf16.msra.mxu2 %v2592_v4  ;;  %886 = vmatpush.bf16.msra.mxu3 %v2631_v5  ;;  %v820_v26 = vrot.slane %v2270_v18, 1  ;;  %v2645_v31 = vld [vmem:[#allocation3 + $0x130] sm:$0xff]  ;;  %v2618_v35 = vld [vmem:[#allocation3 + $0xa8] sm:$0xff]  ;;  %v2604_v37 = vld [vmem:[#allocation3 + $0x60] sm:$0xff]  ;;  %s2847_s9 = sshra.s32 %s2030_s8, 4  ;;  %s2848_s9 = int_to_ptr.hbm [resolvable:$true] %s2847_s9 }
  0x21   : > { %v2684_v34 = vld [vmem:[#allocation3 + $0x1f0] sm:$0xff]  ;;  %v2644_v36 = vld [vmem:[#allocation3 + $0x128] sm:$0xff]  ;;  %v2617_v38 = vld [vmem:[#allocation3 + $0xa0] sm:$0xff]  ;;  %s2849_s10 = scalar_lea.hbm %s2848_s9, 40  ;;  %p2854_p3 = scmp.lt.s32.totalorder %s2848_s9, %s3271_s4 }
  0x22   : > { %v822_v32 = vsel %vm635_vm0, %v820_v26, %v821_v27  ;;  %v2643_v39 = vld [vmem:[#allocation3 + $0x120] sm:$0xff]  ;;  %v2634_v41 = vld [vmem:[%s2994_s12 + $0x4] sm:$0xf0]  ;;  %v3011_v42 = vld [vmem:[%s2994_s12 + $0x14] sm:$0xff]  ;;  %p2850_p0 = scmp.ne.s32.totalorder %s2848_s9, %s2849_s10  ;;  %p2855_p4 = scmp.lt.s32.totalorder %s2853_s13, %s2849_s10 }
  0x23   : > { %320 = vmatpush.bf16.msra.mxu0 %v2591_v6  ;;  %2734 = vmatpush.bf16.msra.mxu1 %v2591_v6  ;;  %v2321_v40 = vld [vmem:[%s2994_s12 + $0x4] sm:$0xe]  ;;  %v2603_v43 = vld [vmem:[#allocation3 + $0x58] sm:$0xff]  ;;  %v2583_v46 = vld [vmem:[%s2994_s12 + $0x8] sm:$0xff]  ;;  %v823_v51 = vrot.slane %v3011_v42, 1 }
  0x24   : > { %2735 = vmatpush.bf16.msra.mxu2 %v2591_v6  ;;  %887 = vmatpush.bf16.msra.mxu3 %v2630_v7  ;;  %v2616_v44 = vld [vmem:[#allocation3 + $0x98] sm:$0xff]  ;;  %v2595_v48 = vld [vmem:[%s2994_s12] sm:$0xff]  ;;  %v2322_v49 = vor.u32 %v2634_v41, %v2321_v40  ;;  %v2635_v50 = vld [vmem:[%s2994_s12 + $0xc] sm:$0xff]  ;;  %p2851_p1 = pnand %p2850_p0, %p2969_p5  ;;  %p2856_p7 = por %p2855_p4, %p2854_p3 }
  0x25   : > { %v2642_v45 = vld [vmem:[#allocation3 + $0x118] sm:$0xff]  ;;  %v2602_v52 = vld [vmem:[#allocation3 + $0x50] sm:$0xff]  ;;  %v2217_v55 = vld [vmem:[%s2994_s12] sm:$0xe]  ;;  %v421_v58 = vshll.u32 %v2595_v48, 16  ;;  %v1014_v62 = vshrl.u32 %v2635_v50, 16  ;;  %v824_v0 = vsel %vm635_vm0, %v821_v27, %v823_v51 }
  0x26   : > { %v2585_v47 = vld [vmem:[%s2994_s12 + $0x18] sm:$0xff]  ;;  %v2615_v53 = vld [vmem:[#allocation3 + $0x90] sm:$0xff]  ;;  %v2608_v56 = vld [vmem:[%s2994_s12] sm:$0xf0]  ;;  %v1006_v59 = vshrl.u32 %v2322_v49, 16  ;;  %v1009_v61 = vshll.u32 %v2322_v49, 16  ;;  %p2852_p2 = pneg %p2851_p1 }
  0x27   : > { %321 = vmatpush.bf16.msra.mxu0 %v2590_v8  ;;  %2736 = vmatpush.bf16.msra.mxu1 %v2590_v8  ;;  %v2641_v54 = vld [vmem:[#allocation3 + $0x110] sm:$0xff]  ;;  %v3021_v57 = vld [vmem:[%s2994_s12 + $0x8] sm:$0xff]  ;;  %v1017_v63 = vshll.u32 %v2635_v50, 16  ;;  %v2218_v5 = vor.u32 %v2608_v56, %v2217_v55  ;;  %v419_v6 = vshrl.u32 %v2595_v48, 16  ;;  %v423_v7 = vrot.slane %v421_v58, 1  ;;  %v2600_v13 = vld [vmem:[#allocation3 + $0x40] sm:$0xff] }
  0x28   : > { %2737 = vmatpush.bf16.msra.mxu2 %v2590_v8  ;;  %888 = vmatpush.bf16.msra.mxu3 %v2629_v9  ;;  %v2683_v60 = vld [vmem:[#allocation3 + $0x1e8] sm:$0xff]  ;;  %v426_v8 = vshll.u32 %v3021_v57, 16  ;;  %v1008_v9 = vrot.slane %v1006_v59, 1  ;;  %v2613_v14 = vld [vmem:[#allocation3 + $0x80] sm:$0xff]  ;;  %v2672_v18 = vld [vmem:[#allocation3 + $0x1b8] sm:$0xff]  ;;  %p2857_p8 = pnand %p2856_p7, %p2852_p2 }
  0x29   : > { %v2601_v1 = vld [vmem:[#allocation3 + $0x48] sm:$0xff]  ;;  %v2639_v17 = vld [vmem:[#allocation3 + $0x100] sm:$0xff]  ;;  %v2668_v55 = vld [vmem:[#allocation3 + $0x198] sm:$0xff] }
  0x2a   : > { %v2614_v2 = vld [vmem:[#allocation3 + $0x88] sm:$0xff]  ;;  %v2669_v49 = vld [vmem:[#allocation3 + $0x1a0] sm:$0xff] }
  0x2b   : > { %322 = vmatpush.bf16.msra.mxu0 %v2589_v10  ;;  %2738 = vmatpush.bf16.msra.mxu1 %v2589_v10  ;;  %v2640_v3 = vld [vmem:[#allocation3 + $0x108] sm:$0xff]  ;;  %v2656_v42 = vld [vmem:[#allocation3 + $0x160] sm:$0xff] }
  0x2c   : > { %2739 = vmatpush.bf16.msra.mxu2 %v2589_v10  ;;  %889 = vmatpush.bf16.msra.mxu3 %v2628_v11  ;;  %v3029_v4 = vld [vmem:[%s2994_s12 + $0x8] sm:$0xff]  ;;  %v1011_v10 = vrot.slane %v1009_v61, 2  ;;  %v1016_v11 = vrot.slane %v1014_v62, 1  ;;  %v2695_v50 = vld [vmem:[#allocation3 + $0x220] sm:$0xff] }
  0x2d   : > { %v2696_v41 = vld [vmem:[#allocation3 + $0x228] sm:$0xff]  ;;  %v2637_v61 = vld [vmem:[%s2994_s12 + $0x1c] sm:$0xff] }
  0x2e   : > { %v3056_v56 = vld [vmem:[%s2994_s12 + $0x24] sm:$0xff] }
  0x2f   : > { %323 = vmatpush.bf16.msra.mxu0 %v2588_v12  ;;  %2740 = vmatpush.bf16.msra.mxu1 %v2588_v12  ;;  %v827_v62 = vrot.slane %v3056_v56, 1 }
  0x30   : > { %2741 = vmatpush.bf16.msra.mxu2 %v2588_v12  ;;  %890 = vmatpush.bf16.msra.mxu3 %v2627_v15  ;;  %v1019_v12 = vrot.slane %v1017_v63, 2  ;;  %v636_v15 = vrot.slane %v2218_v5, 1  ;;  %v2667_v63 = vld [vmem:[#allocation3 + $0x190] sm:$0xff]  ;;  %v1035_v5 = vshll.u32 %v2637_v61, 16 }
  0x33   : > { %324 = vmatpush.bf16.msra.mxu0 %v2587_v16  ;;  %2742 = vmatpush.bf16.msra.mxu1 %v2587_v16 }
  0x34   : > { %2743 = vmatpush.bf16.msra.mxu2 %v2587_v16  ;;  %891 = vmatpush.bf16.msra.mxu3 %v2626_v25  ;;  %v637_v16 = vrot.slane %v3029_v4, 1  ;;  %v3034_v25 = vld [vmem:[%s2994_s12 + $0x1c] sm:$0xff]  ;;  %v1032_v4 = vshrl.u32 %v2637_v61, 16 }
  0x36   : > { %325 = vmatmul.bf16.vlgmr.msra.gmra.mxu0 %v2582_v22  ;;  %335 = vmatmul.bf16.vlgmr.msra.gmra.mxu1 %v2584_v23  ;;  %v1012_v22 = vor.u32 %v1011_v10, %v1008_v9  ;;  %v1020_v23 = vor.u32 %v1019_v12, %v1016_v11  ;;  %v638_v26 = vsel %vm635_vm0, %v636_v15, %v637_v16  ;;  %v774_v9 = vld [vmem:[%s2994_s12 + $0x2c] sm:$0x1]  ;;  %v3071_v11 = vld [vmem:[%s2994_s12 + $0x18] sm:$0xff]  ;;  %v1037_v15 = vrot.slane %v1035_v5, 2 }
  0x37   : > { %515 = vmatpush.bf16.msrb.mxu1 %v2607_v19  ;;  %1111 = vmatpush.bf16.msrb.mxu0 %v2646_v21  ;;  %v2659_v19 = vld [vmem:[#allocation3 + $0x178] sm:$0xff]  ;;  %v428_v21 = vrot.slane %v426_v8, 1  ;;  %v2693_v8 = vld [vmem:[#allocation3 + $0x210] sm:$0xff]  ;;  %v2679_v10 = vld [vmem:[#allocation3 + $0x1c8] sm:$0xff] }
  0x38   : > { %700 = vmatpush.bf16.msrb.mxu2 %v2620_v20  ;;  %1707 = vmatpush.bf16.msrb.mxu3 %v2685_v29  ;;  %v424_v20 = vor.u32 %v423_v7, %v419_v6  ;;  %v2671_v29 = vld [vmem:[#allocation3 + $0x1b0] sm:$0xff]  ;;  %v2666_v7 = vld [vmem:[#allocation3 + $0x188] sm:$0xff] }
  0x39   : > { %345 = vmatmul.bf16.vlgmr.msra.gmra.mxu2 %v2586_v24  ;;  %892 = vmatmul.bf16.vlgmr.msra.gmra.mxu3 %v822_v32  ;;  %v2698_v24 = vld [vmem:[#allocation3 + $0x238] sm:$0xff]  ;;  %v825_v32 = vrot.slane %v3034_v25, 1 }
  0x3a   : > { %v429_v27 = vsel %vm417_vm1, %v424_v20, %v428_v21 }
  0x3b   : > { %516 = vmatpush.bf16.msrb.mxu1 %v2606_v28  ;;  %1112 = vmatpush.bf16.msrb.mxu0 %v2645_v31  ;;  %v1021_v28 = vsel %vm1004_vm2, %v1012_v22, %v1020_v23  ;;  %v2636_v31 = vld [vmem:[%s2994_s12 + $0x14] sm:$0xff]  ;;  %v826_v40 = vsel %vm635_vm0, %v823_v51, %v825_v32  ;;  %v828_v6 = vsel %vm635_vm0, %v825_v32, %v827_v62 }
  0x3c   : > { %701 = vmatpush.bf16.msrb.mxu2 %v2619_v30  ;;  %1708 = vmatpush.bf16.msrb.mxu3 %v2684_v34  ;;  %v2658_v30 = vld [vmem:[#allocation3 + $0x170] sm:$0xff]  ;;  %v2682_v34 = vld [vmem:[#allocation3 + $0x1e0] sm:$0xff] }
  0x3f   : > { %517 = vmatpush.bf16.msrb.mxu1 %v2605_v33  ;;  %1113 = vmatpush.bf16.msrb.mxu0 %v2644_v36  ;;  %v2697_v33 = vld [vmem:[#allocation3 + $0x230] sm:$0xff]  ;;  %v1023_v36 = vshrl.u32 %v2636_v31, 16 }
  0x40   : > { %702 = vmatpush.bf16.msrb.mxu2 %v2618_v35  ;;  %1709 = vmatpush.bf16.msrb.mxu3 %v2683_v60  ;;  %v3044_v35 = vld [vmem:[%s2994_s12 + $0x10] sm:$0xff] }
  0x41   : > { %v438_v12 = vshrl.u32 %v3044_v35, 16 }
  0x43   : > { %518 = vmatpush.bf16.msrb.mxu1 %v2604_v37  ;;  %1114 = vmatpush.bf16.msrb.mxu0 %v2643_v39  ;;  %v1026_v37 = vshll.u32 %v2636_v31, 16  ;;  %v2657_v39 = vld [vmem:[#allocation3 + $0x168] sm:$0xff] }
  0x44   : > { %703 = vmatpush.bf16.msrb.mxu2 %v2617_v38  ;;  %v2670_v38 = vld [vmem:[#allocation3 + $0x1a8] sm:$0xff]  ;;  %1710 = vmatpush.bf16.msrb.mxu3 %v2682_v34 }
  0x45   : > { %v1028_v48 = vrot.slane %v1026_v37, 2  ;;  %v2692_v34 = vld [vmem:[#allocation3 + $0x208] sm:$0xff]  ;;  %v2652_v37 = vld [vmem:[#allocation3 + $0x140] sm:$0xff] }
  0x46   : > { %330 = vmatmul.bf16.gmra.mxu0 %v2583_v46  ;;  %340 = vmatmul.bf16.gmra.mxu1 %v2585_v47  ;;  %v434_v46 = vshll.u32 %v3044_v35, 16  ;;  %v1025_v47 = vrot.slane %v1023_v36, 1  ;;  %v2678_v35 = vld [vmem:[#allocation3 + $0x1c0] sm:$0xff] }
  0x47   : > { %519 = vmatpush.bf16.msrb.mxu1 %v2603_v43  ;;  %1115 = vmatpush.bf16.msrb.mxu0 %v2642_v45  ;;  %v2681_v43 = vld [vmem:[#allocation3 + $0x1d8] sm:$0xff]  ;;  %v430_v45 = vshrl.u32 %v3021_v57, 16 }
  0x48   : > { %704 = vmatpush.bf16.msrb.mxu2 %v2616_v44  ;;  %v3050_v44 = vld [vmem:[%s2994_s12 + $0x10] sm:$0xff]  ;;  %1711 = vmatpush.bf16.msrb.mxu3 %v2681_v43  ;;  %v2655_v57 = vld [vmem:[#allocation3 + $0x158] sm:$0xff] }
  0x49   : > { %897 = vmatmul.bf16.gmra.mxu3 %v824_v0  ;;  %v639_v51 = vrot.slane %v3050_v44, 1  ;;  %v2694_v0 = vld [vmem:[#allocation3 + $0x218] sm:$0xff] }
  0x4b   : > { %520 = vmatpush.bf16.msrb.mxu1 %v2602_v52  ;;  %1116 = vmatpush.bf16.msrb.mxu0 %v2641_v54  ;;  %v432_v52 = vor.u32 %v430_v45, %v428_v21  ;;  %v1029_v54 = vor.u32 %v1028_v48, %v1025_v47  ;;  %v640_v58 = vsel %vm635_vm0, %v637_v16, %v639_v51  ;;  %v813_v16 = vunpack.c.l.b16 %v774_v9 }
  0x4c   : > { %705 = vmatpush.bf16.msrb.mxu2 %v2615_v53  ;;  %v436_v53 = vrot.slane %v434_v46, 1  ;;  %v958_v46 = vld [vmem:[%s2994_s12 + $0x2c] sm:$0x3] }
  0x4d   : > { %v1030_v60 = vsel %vm1004_vm2, %v1020_v23, %v1029_v54  ;;  %v819_v21 = vpack.c.b16 %v813_v16, %v813_v16  ;;  %v2638_v23 = vld [vmem:[%s2994_s12 + $0x24] sm:$0xff] }
  0x4e   : > { %v437_v59 = vsel %vm417_vm1, %v432_v52, %v436_v53  ;;  %v1041_v31 = vshrl.u32 %v2638_v23, 16  ;;  %v1044_v32 = vshll.u32 %v2638_v23, 16 }
  0x4f   : > { %521 = vmatpush.bf16.msrb.mxu1 %v2601_v1  ;;  %1117 = vmatpush.bf16.msrb.mxu0 %v2640_v3  ;;  %v2680_v1 = vld [vmem:[#allocation3 + $0x1d0] sm:$0xff]  ;;  %v3066_v3 = vld [vmem:[%s2994_s12 + $0x18] sm:$0xff] }
  0x50   : > { %706 = vmatpush.bf16.msrb.mxu2 %v2614_v2  ;;  %v2654_v2 = vld [vmem:[#allocation3 + $0x150] sm:$0xff]  ;;  %1712 = vmatpush.bf16.msrb.mxu3 %v2680_v1  ;;  %v1043_v44 = vrot.slane %v1041_v31, 1  ;;  %v1046_v45 = vrot.slane %v1044_v32, 2  ;;  %v2647_v31 = vld [vmem:[%s2994_s12 + $0x4] sm:$0xf0] }
  0x53   : > { %522 = vmatpush.bf16.msrb.mxu1 %v2600_v13  ;;  %1118 = vmatpush.bf16.msrb.mxu0 %v2639_v17  ;;  %v442_v13 = vshll.u32 %v3066_v3, 16  ;;  %v641_v17 = vrot.slane %v3071_v11, 1 }
  0x54   : > { %707 = vmatpush.bf16.msrb.mxu2 %v2613_v14  ;;  %v1034_v14 = vrot.slane %v1032_v4, 1  ;;  %1713 = vmatpush.bf16.msrb.mxu3 %v2679_v10  ;;  %v2675_v10 = vld [vmem:[%s2994_s12 + $0x18] sm:$0xff] }
  0x55   : > { %v642_v22 = vsel %vm635_vm0, %v639_v51, %v641_v17  ;;  %v1619_v16 = vshrl.u32 %v2675_v10, 16 }
  0x56   : > { %523 = vmatmul.bf16.vlgmr.msrb.gmra.mxu1 %v429_v27  ;;  %1119 = vmatmul.bf16.vlgmr.msrb.gmra.mxu0 %v1021_v28  ;;  %v1038_v20 = vor.u32 %v1037_v15, %v1034_v14  ;;  %v2653_v27 = vld [vmem:[#allocation3 + $0x148] sm:$0xff] }
  0x57   : > { %1296 = vmatpush.bf16.msra.mxu1 %v2659_v19  ;;  %1892 = vmatpush.bf16.msra.mxu0 %v2698_v24  ;;  %v444_v19 = vrot.slane %v442_v13, 1  ;;  %v2477_v28 = vld [vmem:[%s2994_s12 + $0x8] sm:$0xc] }
  0x58   : > { %1480 = vmatpush.bf16.msra.mxu2 %v2672_v18  ;;  %v440_v18 = vor.u32 %v438_v12, %v436_v53  ;;  %v1039_v25 = vsel %vm1004_vm2, %v1029_v54, %v1038_v20  ;;  %1714 = vmatpush.bf16.msrb.mxu3 %v2678_v35  ;;  %v1047_v53 = vor.u32 %v1046_v45, %v1043_v44  ;;  %v997_v54 = vunpack.c.l.b16 %v958_v46  ;;  %v2686_v35 = vld [vmem:[%s2994_s12 + $0x8] sm:$0xf0] }
  0x59   : > { %708 = vmatmul.bf16.vlgmr.msrb.gmra.mxu2 %v638_v26  ;;  %902 = vmatmul.bf16.gmra.mxu3 %v826_v40  ;;  %v829_v26 = vrot.slane %v819_v21, 1  ;;  %v2612_v40 = vld [vmem:[%s2994_s12 + $0x20] sm:$0xff] }
  0x5a   : > { %v445_v24 = vsel %vm417_vm1, %v440_v18, %v444_v19  ;;  %v1048_v1 = vsel %vm1004_vm2, %v1038_v20, %v1047_v53 }
  0x5b   : > { %1297 = vmatpush.bf16.msra.mxu1 %v2658_v30  ;;  %1893 = vmatpush.bf16.msra.mxu0 %v2697_v33  ;;  %v3083_v30 = vld [vmem:[%s2994_s12 + $0x20] sm:$0xff]  ;;  %v830_v36 = vsel %vm635_vm0, %v827_v62, %v829_v26  ;;  %v589_v62 = vld [vmem:[%s2994_s12 + $0x28] sm:$0x1] }
  0x5c   : > { %1481 = vmatpush.bf16.msra.mxu2 %v2671_v29  ;;  %v2673_v29 = vld [vmem:[%s2994_s12 + $0x8] sm:$0xf0]  ;;  %v2665_v33 = vld [vmem:[#allocation3 + $0x180] sm:$0xff]  ;;  %v450_v43 = vshll.u32 %v3083_v30, 16  ;;  %v628_v5 = vunpack.c.l.b16 %v589_v62  ;;  %v454_v12 = vshrl.u32 %v3083_v30, 16 }
  0x5d   : > { %v2373_v30 = vld [vmem:[%s2994_s12 + $0x4] sm:$0xc] }
  0x5e   : > { %v452_v52 = vrot.slane %v450_v43, 1  ;;  %v634_v11 = vpack.c.b16 %v628_v5, %v628_v5  ;;  %v1554_v5 = vld [vmem:[%s2994_s12 + $0x30] sm:$0x7] }
  0x5f   : > { %1298 = vmatpush.bf16.msra.mxu1 %v2657_v39  ;;  %1894 = vmatpush.bf16.msra.mxu0 %v2696_v41  ;;  %v2478_v39 = vor.u32 %v2673_v29, %v2477_v28  ;;  %v446_v41 = vshrl.u32 %v3066_v3, 16  ;;  %v2425_v28 = vld [vmem:[%s2994_s12 + $0x8] sm:$0xc]  ;;  %v2660_v29 = vld [vmem:[%s2994_s12 + $0x8] sm:$0xf0] }
  0x60   : > { %1482 = vmatpush.bf16.msra.mxu2 %v2670_v38  ;;  %v2674_v38 = vld [vmem:[%s2994_s12 + $0x10] sm:$0xff]  ;;  %v645_v18 = vrot.slane %v634_v11, 1  ;;  %v1593_v11 = vunpack.c.l.b16 %v1554_v5 }
  0x61   : > { %v1602_v47 = vshrl.u32 %v2478_v39, 16  ;;  %v1605_v48 = vshll.u32 %v2478_v39, 16  ;;  %v448_v51 = vor.u32 %v446_v41, %v444_v19  ;;  %v456_v19 = vor.u32 %v454_v12, %v452_v52 }
  0x62   : > { %v2374_v39 = vor.u32 %v2647_v31, %v2373_v30 }
  0x63   : > { %1299 = vmatpush.bf16.msra.mxu1 %v2656_v42  ;;  %1895 = vmatpush.bf16.msra.mxu0 %v2695_v50  ;;  %v1613_v42 = vshll.u32 %v2674_v38, 16  ;;  %v643_v50 = vrot.slane %v2612_v40, 1  ;;  %v1604_v56 = vrot.slane %v1602_v47, 2  ;;  %v453_v61 = vsel %vm417_vm1, %v448_v51, %v452_v52  ;;  %v2687_v40 = vld [vmem:[%s2994_s12 + $0x10] sm:$0xff] }
  0x64   : > { %1483 = vmatpush.bf16.msra.mxu2 %v2669_v49  ;;  %v1610_v49 = vshrl.u32 %v2674_v38, 16  ;;  %v2648_v38 = vld [vmem:[%s2994_s12 + $0xc] sm:$0xff]  ;;  %v1232_v47 = vrot.slane %v2374_v39, 2  ;;  %v2651_v39 = vld [vmem:[%s2994_s12 + $0x24] sm:$0xff] }
  0x66   : > { %528 = vmatmul.bf16.gmra.mxu1 %v437_v59  ;;  %1124 = vmatmul.bf16.gmra.mxu0 %v1030_v60  ;;  %v1615_v59 = vrot.slane %v1613_v42, 3  ;;  %v644_v60 = vsel %vm635_vm0, %v641_v17, %v643_v50  ;;  %v1622_v17 = vshll.u32 %v2675_v10, 16  ;;  %v1829_v42 = vrot.slane %v2687_v40, 3  ;;  %v2690_v40 = vld [vmem:[%s2994_s12 + $0x28] sm:$0xff] }
  0x67   : > { %1300 = vmatpush.bf16.msra.mxu1 %v2655_v57  ;;  %1896 = vmatpush.bf16.msra.mxu0 %v2694_v0  ;;  %v1607_v57 = vrot.slane %v1605_v48, 3  ;;  %v2691_v0 = vld [vmem:[#allocation3 + $0x200] sm:$0xff]  ;;  %v1233_v48 = vrot.slane %v2648_v38, 2 }
  0x68   : > { %1484 = vmatpush.bf16.msra.mxu2 %v2668_v55  ;;  %v371_v55 = vld [vmem:[%s2994_s12 + $0x28] sm:$0x1]  ;;  %v1624_v23 = vrot.slane %v1622_v17, 3  ;;  %v2650_v17 = vld [vmem:[%s2994_s12 + $0x1c] sm:$0xff] }
  0x69   : > { %713 = vmatmul.bf16.gmra.mxu2 %v640_v58  ;;  %907 = vmatmul.bf16.gmra.mxu3 %v828_v6  ;;  %v1612_v58 = vrot.slane %v1610_v49, 2  ;;  %v1608_v3 = vor.u32 %v1607_v57, %v1604_v56  ;;  %v2677_v57 = vld [vmem:[%s2994_s12 + $0x28] sm:$0xff] }
  0x6a   : > { %v1640_v62 = vshll.u32 %v2677_v57, 16 }
  0x6b   : > { %1301 = vmatpush.bf16.msra.mxu1 %v2654_v2  ;;  %1897 = vmatpush.bf16.msra.mxu0 %v2693_v8  ;;  %v1003_v2 = vpack.c.b16 %v997_v54, %v997_v54  ;;  %v1616_v4 = vor.u32 %v1615_v59, %v1612_v58  ;;  %v2662_v58 = vld [vmem:[%s2994_s12 + $0x18] sm:$0xff] }
  0x6c   : > { %1485 = vmatpush.bf16.msra.mxu2 %v2667_v63  ;;  %v410_v63 = vunpack.c.l.b16 %v371_v55  ;;  %v2649_v59 = vld [vmem:[%s2994_s12 + $0x14] sm:$0xff] }
  0x6d   : > { %v1053_v8 = vshll.u32 %v1003_v2, 16  ;;  %v1617_v9 = vsel %vm1600_vm3, %v1608_v3, %v1616_v4  ;;  %v1642_v3 = vrot.slane %v1640_v62, 3 }
  0x6e   : > { %v416_v6 = vpack.c.b16 %v410_v63, %v410_v63  ;;  %v1419_v63 = vrot.slane %v2662_v58, 2 }
  0x6f   : > { %1302 = vmatpush.bf16.msra.mxu1 %v2653_v27  ;;  %1898 = vmatpush.bf16.msra.mxu0 %v2692_v34  ;;  %v1055_v15 = vrot.slane %v1053_v8, 2  ;;  %v2529_v34 = vld [vmem:[%s2994_s12 + $0x8] sm:$0x8] }
  0x70   : > { %1486 = vmatpush.bf16.msra.mxu2 %v2666_v7  ;;  %v1050_v7 = vshrl.u32 %v1003_v2, 16  ;;  %v458_v13 = vshll.u32 %v416_v6, 16  ;;  %v2530_v41 = vor.u32 %v2686_v35, %v2529_v34 }
  0x72   : > { %v1052_v14 = vrot.slane %v1050_v7, 1  ;;  %v460_v20 = vrot.slane %v458_v13, 1  ;;  %v1828_v49 = vrot.slane %v2530_v41, 3  ;;  %v1599_v13 = vpack.c.b16 %v1593_v11, %v1593_v11 }
  0x73   : > { %1303 = vmatpush.bf16.msra.mxu1 %v2652_v37  ;;  %1899 = vmatpush.bf16.msra.mxu0 %v2691_v0  ;;  %v2426_v37 = vor.u32 %v2660_v29, %v2425_v28  ;;  %v1235_v0 = vrot.slane %v2649_v59, 2 }
  0x74   : > { %1487 = vmatpush.bf16.msra.mxu2 %v2665_v33  ;;  %v1056_v21 = vor.u32 %v1055_v15, %v1052_v14  ;;  %v2676_v33 = vld [vmem:[%s2994_s12 + $0x20] sm:$0xff]  ;;  %v1830_v54 = vsel %vm1827_vm5, %v1828_v49, %v1829_v42 }
  0x75   : > { %v1628_v43 = vshrl.u32 %v2676_v33, 16  ;;  %v1631_v44 = vshll.u32 %v2676_v33, 16  ;;  %v1416_v45 = vrot.slane %v2426_v37, 2  ;;  %v1236_v8 = vsel %vm1231_vm4, %v1233_v48, %v1235_v0  ;;  %v2663_v14 = vld [vmem:[%s2994_s12 + $0x20] sm:$0xff] }
  0x76   : > { %533 = vmatmul.bf16.gmra.mxu1 %v445_v24  ;;  %1129 = vmatmul.bf16.gmra.mxu0 %v1039_v25  ;;  %v646_v24 = vsel %vm635_vm0, %v643_v50, %v645_v18  ;;  %v461_v25 = vsel %vm417_vm1, %v456_v19, %v460_v20  ;;  %v1057_v26 = vsel %vm1004_vm2, %v1047_v53, %v1056_v21  ;;  %v2689_v18 = vld [vmem:[%s2994_s12 + $0x20] sm:$0xff]  ;;  %v1646_v19 = vshrl.u32 %v1599_v13, 16 }
  0x77   : > { %v1630_v50 = vrot.slane %v1628_v43, 2  ;;  %v1633_v51 = vrot.slane %v1631_v44, 3  ;;  %v1234_v53 = vsel %vm1231_vm4, %v1232_v47, %v1233_v48  ;;  %v1649_v20 = vshll.u32 %v1599_v13, 16  ;;  %v1370_v48 = vld [vmem:[%s2994_s12 + $0x30] sm:$0x3] }
  0x78   : > { %v1421_v21 = vrot.slane %v2663_v14, 2 }
  0x79   : > { %718 = vmatmul.bf16.gmra.mxu2 %v642_v22  ;;  %912 = vmatmul.bf16.gmra.mxu3 %v830_v36  ;;  %v1621_v22 = vrot.slane %v1619_v16, 2  ;;  %v2661_v36 = vld [vmem:[%s2994_s12 + $0x10] sm:$0xff]  ;;  %v1634_v55 = vor.u32 %v1633_v51, %v1630_v50 }
  0x7a   : > { %v1417_v46 = vrot.slane %v2661_v36, 2  ;;  %v2664_v36 = vld [vmem:[%s2994_s12 + $0x28] sm:$0xff] }
  0x7b   : > { %v1625_v27 = vor.u32 %v1624_v23, %v1621_v22  ;;  %v1237_v23 = vrot.slane %v2650_v17, 2  ;;  %v1423_v41 = vrot.slane %v2664_v36, 2 }
  0x7c   : > { %v1418_v52 = vsel %vm1231_vm4, %v1416_v45, %v1417_v46  ;;  %v1239_v45 = vrot.slane %v2651_v39, 2 }
  0x7d   : > { %v1626_v32 = vsel %vm1600_vm3, %v1616_v4, %v1625_v27  ;;  %v1635_v56 = vsel %vm1600_vm3, %v1625_v27, %v1634_v55  ;;  %v1420_v4 = vsel %vm1231_vm4, %v1417_v46, %v1419_v63  ;;  %v1422_v27 = vsel %vm1231_vm4, %v1419_v63, %v1421_v21 }
  0x7e   : > { %v1238_v30 = vsel %vm1231_vm4, %v1235_v0, %v1237_v23  ;;  %v1835_v46 = vrot.slane %v2690_v40, 3  ;;  %v1424_v47 = vsel %vm1231_vm4, %v1421_v21, %v1423_v41  ;;  %v1240_v50 = vsel %vm1231_vm4, %v1237_v23, %v1239_v45 }
  0x86   : > { %538 = vmatmul.bf16.gmra.mxu1 %v453_v61  ;;  %1134 = vmatmul.bf16.gmra.mxu0 %v1048_v1  ;;  %v1637_v61 = vshrl.u32 %v2677_v57, 16 }
  0x88   : > { %v1639_v2 = vrot.slane %v1637_v61, 2 }
  0x89   : > { %723 = vmatmul.bf16.gmra.mxu2 %v644_v60  ;;  %1715 = vmatmul.bf16.vlgmr.msrb.gmra.mxu3 %v1617_v9  ;;  %v2688_v60 = vld [vmem:[%s2994_s12 + $0x18] sm:$0xff] }
  0x8a   : > { %v1831_v1 = vrot.slane %v2688_v60, 3  ;;  %v1643_v10 = vor.u32 %v1642_v3, %v1639_v2 }
  0x8c   : > { %v1832_v9 = vsel %vm1827_vm5, %v1829_v42, %v1831_v1  ;;  %v1644_v12 = vsel %vm1600_vm3, %v1634_v55, %v1643_v10  ;;  %v1409_v55 = vunpack.c.l.b16 %v1370_v48 }
  0x8e   : > { %v1415_v61 = vpack.c.b16 %v1409_v55, %v1409_v55 }
  0x90   : > { %v1425_v5 = vrot.slane %v1415_v61, 2 }
  0x96   : > { %543 = vmatmul.bf16.gmra.mxu1 %v461_v25  ;;  %1139 = vmatmul.bf16.gmra.mxu0 %v1057_v26  ;;  %v1648_v25 = vrot.slane %v1646_v19, 2  ;;  %v1651_v26 = vrot.slane %v1649_v20, 3 }
  0x99   : > { %728 = vmatmul.bf16.gmra.mxu2 %v646_v24  ;;  %1720 = vmatmul.bf16.gmra.mxu3 %v1626_v32  ;;  %v1833_v24 = vrot.slane %v2689_v18, 3  ;;  %v1652_v32 = vor.u32 %v1651_v26, %v1648_v25 }
  0x9b   : > { %v1834_v31 = vsel %vm1827_vm5, %v1831_v1, %v1833_v24  ;;  %v1653_v35 = vsel %vm1600_vm3, %v1643_v10, %v1652_v32  ;;  %v1836_v51 = vsel %vm1827_vm5, %v1833_v24, %v1835_v46 }
  0xa6   : > { %1304 = vmatmul.bf16.vlgmr.msra.gmra.mxu1 %v1234_v53  ;;  %1900 = vmatmul.bf16.vlgmr.msra.gmra.mxu0 %v1830_v54  ;;  %v1185_v53 = vld [vmem:[%s2994_s12 + $0x2c] sm:$0x3]  ;;  %v1781_v54 = vld [vmem:[%s2994_s12 + $0x30] sm:$0x7] }
  0xa7   : > { %v1224_v58 = vunpack.c.l.b16 %v1185_v53  ;;  %v1820_v59 = vunpack.c.l.b16 %v1781_v54 }
  0xa9   : > { %1488 = vmatmul.bf16.vlgmr.msra.gmra.mxu2 %v1418_v52  ;;  %1725 = vmatmul.bf16.gmra.mxu3 %v1635_v56  ;;  %v1230_v1 = vpack.c.b16 %v1224_v58, %v1224_v58  ;;  %v1826_v2 = vpack.c.b16 %v1820_v59, %v1820_v59 }
  0xab   : > { %v1837_v10 = vrot.slane %v1826_v2, 3 }
  0xad   : > { %v1838_v19 = vsel %vm1827_vm5, %v1835_v46, %v1837_v10 }
  0xb3   : > { %v326_v6 = vpop.f32.mrf.mxu0  ;;  %v3123_v7 = vpop.f32.mrf.mxu1 }
  0xb6   : > { %1309 = vmatmul.bf16.gmra.mxu1 %v1236_v8  ;;  %1905 = vmatmul.bf16.gmra.mxu0 %v1832_v9  ;;  %v1241_v9 = vrot.slane %v1230_v1, 2 }
  0xb8   : > { %v1242_v18 = vsel %vm1231_vm4, %v1239_v45, %v1241_v9 }
  0xb9   : > { %1493 = vmatmul.bf16.gmra.mxu2 %v1420_v4  ;;  %1730 = vmatmul.bf16.gmra.mxu3 %v1644_v12  ;;  %v1426_v12 = vsel %vm1231_vm4, %v1423_v41, %v1425_v5 }
  0xbb   : > { %v328_v15 = vpop.f32.mrf.mxu0  ;;  %v3129_v16 = vpop.f32.mrf.mxu1 }
  0xbc   : > { %v893_v22 = vpop.f32.mrf.mxu3  ;;  %v3138_v33 = vpop.f32.mrf.mxu2 }
  0xc3   : > { %v331_v28 = vpop.f32.mrf.mxu0  ;;  %v3134_v29 = vpop.f32.mrf.mxu1 }
  0xc4   : > { %v895_v34 = vpop.f32.mrf.mxu3  ;;  %v3146_v44 = vpop.f32.mrf.mxu2 }
  0xc6   : > { %1314 = vmatmul.bf16.gmra.mxu1 %v1238_v30  ;;  %1910 = vmatmul.bf16.gmra.mxu0 %v1834_v31 }
  0xc9   : > { %1498 = vmatmul.bf16.gmra.mxu2 %v1422_v27  ;;  %1735 = vmatmul.bf16.gmra.mxu3 %v1653_v35 }
  0xcb   : > { %v333_v37 = vpop.f32.mrf.mxu0  ;;  %v3142_v38 = vpop.f32.mrf.mxu1 }
  0xcc   : > { %v898_v43 = vpop.f32.mrf.mxu3 }
  0xd3   : > { %v524_v49 = vpop.f32.mrf.mxu1  ;;  %v1120_v42 = vpop.f32.mrf.mxu0 }
  0xd4   : > { %v559_v52 = vadd.f32 %v524_v49, %v326_v6  ;;  %v900_v56 = vpop.f32.mrf.mxu3 }
  0xd6   : > { %1319 = vmatmul.bf16.gmra.mxu1 %v1240_v50  ;;  %1915 = vmatmul.bf16.gmra.mxu0 %v1836_v51 }
  0xd9   : > { %1503 = vmatmul.bf16.gmra.mxu2 %v1424_v47 }
  0xdb   : > { %v526_v63 = vpop.f32.mrf.mxu1  ;;  %v1122_v0 = vpop.f32.mrf.mxu0 }
  0xdc   : > { %v709_v57 = vpop.f32.mrf.mxu2  ;;  %v560_v3 = vadd.f32 %v526_v63, %v328_v15  ;;  %v903_v6 = vpop.f32.mrf.mxu3 }
  0xdd   : > { %v744_v60 = vadd.f32 %v709_v57, %v559_v52 }
  0xdf   : > { %v928_v62 = vadd.f32 %v893_v22, %v744_v60 }
  0xe1   : > { %v3154_v4 = vadd.f32 %v1120_v42, %v928_v62 }
  0xe3   : > { %v529_v14 = vpop.f32.mrf.mxu1  ;;  %v1125_v17 = vpop.f32.mrf.mxu0 }
  0xe4   : > { %v711_v8 = vpop.f32.mrf.mxu2  ;;  %v561_v20 = vadd.f32 %v529_v14, %v331_v28  ;;  %v905_v21 = vpop.f32.mrf.mxu3 }
  0xe5   : > { %v745_v11 = vadd.f32 %v711_v8, %v560_v3 }
  0xe6   : > { %1324 = vmatmul.bf16.gmra.mxu1 %v1242_v18  ;;  %1920 = vmatmul.bf16.gmra.mxu0 %v1838_v19 }
  0xe7   : > { %v929_v13 = vadd.f32 %v895_v34, %v745_v11 }
  0xe9   : > { %1508 = vmatmul.bf16.gmra.mxu2 %v1426_v12  ;;  %v3159_v15 = vadd.f32 %v1122_v0, %v929_v13 }
  0xeb   : > { %v531_v25 = vpop.f32.mrf.mxu1  ;;  %v1127_v26 = vpop.f32.mrf.mxu0 }
  0xec   : > { %v714_v22 = vpop.f32.mrf.mxu2  ;;  %v562_v27 = vadd.f32 %v531_v25, %v333_v37  ;;  %v908_v31 = vpop.f32.mrf.mxu3 }
  0xed   : > { %v746_v23 = vadd.f32 %v714_v22, %v561_v20 }
  0xef   : > { %v930_v24 = vadd.f32 %v898_v43, %v746_v23 }
  0xf1   : > { %v3161_v30 = vadd.f32 %v1125_v17, %v930_v24 }
  0xf3   : > { %v534_v36 = vpop.f32.mrf.mxu1  ;;  %v1130_v28 = vpop.f32.mrf.mxu0 }
  0xf4   : > { %v716_v32 = vpop.f32.mrf.mxu2  ;;  %v563_v39 = vadd.f32 %v534_v36, %v3123_v7  ;;  %v910_v46 = vpop.f32.mrf.mxu3 }
  0xf5   : > { %v747_v34 = vadd.f32 %v716_v32, %v562_v27 }
  0xf7   : > { %v931_v35 = vadd.f32 %v900_v56, %v747_v34 }
  0xf9   : > { %v3164_v40 = vadd.f32 %v1127_v26, %v931_v35  ;;  %v3188_v35 = vld [vmem:[%s3269_s2] ss:$0 sm:$0xff] }
  0xfb   : > { %v536_v43 = vpop.f32.mrf.mxu1  ;;  %v1132_v48 = vpop.f32.mrf.mxu0 }
  0xfc   : > { %v719_v41 = vpop.f32.mrf.mxu2  ;;  %v564_v37 = vadd.f32 %v536_v43, %v3129_v16  ;;  %v913_v52 = vpop.f32.mrf.mxu3 }
  0xfd   : > { %v748_v45 = vadd.f32 %v719_v41, %v563_v39 }
  0xff   : > { %v932_v47 = vadd.f32 %v903_v6, %v748_v45  ;;  %v3195_v45 = vld [vmem:[%s3270_s3] ss:$0 sm:$0xff] }
 0x101   : > { %v3167_v49 = vadd.f32 %v1130_v28, %v932_v47 }
 0x103   : > { %v539_v53 = vpop.f32.mrf.mxu1  ;;  %v1135_v54 = vpop.f32.mrf.mxu0 }
 0x104   : > { %v721_v42 = vpop.f32.mrf.mxu2  ;;  %v565_v7 = vadd.f32 %v539_v53, %v3134_v29  ;;  %v915_v16 = vpop.f32.mrf.mxu3 }
 0x105   : > { %v749_v50 = vadd.f32 %v721_v42, %v564_v37 }
 0x107   : > { %v933_v51 = vadd.f32 %v905_v21, %v749_v50 }
 0x109   : > { %v3170_v55 = vadd.f32 %v1132_v48, %v933_v51 }
 0x10b   : > { %v541_v59 = vpop.f32.mrf.mxu1  ;;  %v1137_v60 = vpop.f32.mrf.mxu0 }
 0x10c   : > { %v724_v56 = vpop.f32.mrf.mxu2  ;;  %v566_v61 = vadd.f32 %v541_v59, %v3142_v38  ;;  %v1716_v6 = vpop.f32.mrf.mxu3 }
 0x10d   : > { %v750_v57 = vadd.f32 %v724_v56, %v565_v7 }
 0x10f   : > { %v934_v58 = vadd.f32 %v908_v31, %v750_v57 }
 0x111   : > { %v3173_v62 = vadd.f32 %v1135_v54, %v934_v58 }
 0x113   : > { %v544_v2 = vpop.f32.mrf.mxu1  ;;  %v1140_v3 = vpop.f32.mrf.mxu0 }
 0x114   : > { %v726_v63 = vpop.f32.mrf.mxu2  ;;  %v567_v5 = vadd.f32 %v544_v2, %v3138_v33  ;;  %v1718_v18 = vpop.f32.mrf.mxu3 }
 0x115   : > { %v751_v0 = vadd.f32 %v726_v63, %v566_v61 }
 0x117   : > { %v935_v1 = vadd.f32 %v910_v46, %v751_v0 }
 0x119   : > { %v3176_v29 = vadd.f32 %v1137_v60, %v935_v1 }
 0x11b   : > { %v546_v11 = vpop.f32.mrf.mxu1  ;;  %v1142_v12 = vpop.f32.mrf.mxu0 }
 0x11c   : > { %v729_v8 = vpop.f32.mrf.mxu2  ;;  %v568_v38 = vadd.f32 %v546_v11, %v3146_v44  ;;  %v1721_v25 = vpop.f32.mrf.mxu3 }
 0x11d   : > { %v752_v9 = vadd.f32 %v729_v8, %v567_v5 }
 0x11f   : > { %v936_v10 = vadd.f32 %v913_v52, %v752_v9 }
 0x121   : > { %v3179_v13 = vadd.f32 %v1140_v3, %v936_v10 }
 0x123   : > { %v1305_v20 = vpop.f32.mrf.mxu1  ;;  %v1901_v21 = vpop.f32.mrf.mxu0 }
 0x124   : > { %v731_v14 = vpop.f32.mrf.mxu2  ;;  %v1340_v33 = vadd.f32 %v1305_v20, %v3154_v4  ;;  %v1723_v47 = vpop.f32.mrf.mxu3 }
 0x125   : > { %v753_v17 = vadd.f32 %v731_v14, %v568_v38 }
 0x127   : > { %v937_v19 = vadd.f32 %v915_v16, %v753_v17 }
 0x129   : > { %v3182_v22 = vadd.f32 %v1142_v12, %v937_v19 }
 0x12b   : > { %v1307_v26 = vpop.f32.mrf.mxu1  ;;  %v1903_v27 = vpop.f32.mrf.mxu0 }
 0x12c   : > { %v1489_v23 = vpop.f32.mrf.mxu2  ;;  %v1341_v31 = vadd.f32 %v1307_v26, %v3159_v15  ;;  %v1726_v56 = vpop.f32.mrf.mxu3 }
 0x12d   : > { %v1524_v24 = vadd.f32 %v1489_v23, %v1340_v33 }
 0x12f   : > { %v1751_v44 = vadd.f32 %v1716_v6, %v1524_v24 }
 0x131   : > { %v1936_v34 = vadd.f32 %v1901_v21, %v1751_v44 }
 0x133   : > { %v1310_v28 = vpop.f32.mrf.mxu1  ;;  %v1906_v39 = vpop.f32.mrf.mxu0  ;;  %v1970_v41 = vmul.f32 %v3188_v35, %v1936_v34 }
 0x134   : > { %v1491_v32 = vpop.f32.mrf.mxu2  ;;  %v1342_v46 = vadd.f32 %v1310_v28, %v3161_v30  ;;  %v1728_v6 = vpop.f32.mrf.mxu3 }
 0x135   : > { %v1525_v36 = vadd.f32 %v1491_v32, %v1341_v31  ;;  %v1984_v37 = vadd.f32 %v3195_v45, %v1970_v41 }
 0x137   : > { %v1752_v4 = vadd.f32 %v1718_v18, %v1525_v36 }
 0x139   : > { %v1937_v15 = vadd.f32 %v1903_v27, %v1752_v4 }
 0x13b   : > { %v1971_v43 = vmul.f32 %v3188_v35, %v1937_v15  ;;  %v1312_v52 = vpop.f32.mrf.mxu1  ;;  %v1908_v53 = vpop.f32.mrf.mxu0 }
 0x13c   : > { %v1494_v48 = vpop.f32.mrf.mxu2  ;;  %v1343_v30 = vadd.f32 %v1312_v52, %v3164_v40  ;;  %v1731_v18 = vpop.f32.mrf.mxu3 }
 0x13d   : > { %v1985_v42 = vadd.f32 %v3195_v45, %v1971_v43  ;;  %v1526_v50 = vadd.f32 %v1494_v48, %v1342_v46 }
 0x13f   : > { %v2702_v51 = vpack.c.bf16 %v1985_v42, %v1984_v37  ;;  %v1753_v54 = vadd.f32 %v1721_v25, %v1526_v50 }
 0x141   : > { %2703 = vst [vmem:[%s3203_s28] sm:$0xff] %v2702_v51   ;;  %v1938_v57 = vadd.f32 %v1906_v39, %v1753_v54 }
 0x143   : > { %v1315_v60 = vpop.f32.mrf.mxu1  ;;  %v1911_v61 = vpop.f32.mrf.mxu0  ;;  %v1972_v16 = vmul.f32 %v3188_v35, %v1938_v57 }
 0x144   : > { %v1496_v7 = vpop.f32.mrf.mxu2  ;;  %v1344_v0 = vadd.f32 %v1315_v60, %v3167_v49  ;;  %v1733_v36 = vpop.f32.mrf.mxu3 }
 0x145   : > { %v1527_v58 = vadd.f32 %v1496_v7, %v1343_v30  ;;  %v1986_v3 = vadd.f32 %v3195_v45, %v1972_v16 }
 0x147   : > { %v1754_v59 = vadd.f32 %v1723_v47, %v1527_v58 }
 0x149   : > { %v1939_v63 = vadd.f32 %v1908_v53, %v1754_v59 }
 0x14b   : > { %v1973_v1 = vmul.f32 %v3188_v35, %v1939_v63  ;;  %v1317_v9 = vpop.f32.mrf.mxu1  ;;  %v1913_v10 = vpop.f32.mrf.mxu0 }
 0x14c   : > { %v1499_v2 = vpop.f32.mrf.mxu2  ;;  %v1345_v12 = vadd.f32 %v1317_v9, %v3170_v55  ;;  %v1736_v37 = vpop.f32.mrf.mxu3 }
 0x14d   : > { %v1987_v40 = vadd.f32 %v3195_v45, %v1973_v1  ;;  %v1528_v5 = vadd.f32 %v1499_v2, %v1344_v0 }
 0x14f   : > { %v2707_v8 = vpack.c.bf16 %v1987_v40, %v1986_v3  ;;  %v1755_v11 = vadd.f32 %v1726_v56, %v1528_v5 }
 0x151   : > { %2724 = vst [vmem:[%s3203_s28 + $0x8] sm:$0xff] %v2707_v8   ;;  %v1940_v14 = vadd.f32 %v1911_v61, %v1755_v11 }
 0x153   : > { %v1320_v19 = vpop.f32.mrf.mxu1  ;;  %v1974_v20 = vmul.f32 %v3188_v35, %v1940_v14  ;;  %v1916_v23 = vpop.f32.mrf.mxu0 }
 0x154   : > { %v1501_v38 = vpop.f32.mrf.mxu2  ;;  %v1346_v33 = vadd.f32 %v1320_v19, %v3173_v62  ;;  %v1738_v60 = vpop.f32.mrf.mxu3 }
 0x155   : > { %v1529_v49 = vadd.f32 %v1501_v38, %v1345_v12  ;;  %v1988_v26 = vadd.f32 %v3195_v45, %v1974_v20 }
 0x157   : > { %v1756_v17 = vadd.f32 %v1728_v6, %v1529_v49 }
 0x159   : > { %v1941_v21 = vadd.f32 %v1913_v10, %v1756_v17 }
 0x15b   : > { %v1975_v24 = vmul.f32 %v3188_v35, %v1941_v21  ;;  %v1322_v31 = vpop.f32.mrf.mxu1  ;;  %v1918_v4 = vpop.f32.mrf.mxu0 }
 0x15c   : > { %v1504_v25 = vpop.f32.mrf.mxu2  ;;  %v1347_v34 = vadd.f32 %v1322_v31, %v3176_v29 }
 0x15d   : > { %v1989_v55 = vadd.f32 %v3195_v45, %v1975_v24  ;;  %v1530_v27 = vadd.f32 %v1504_v25, %v1346_v33 }
 0x15f   : > { %v2712_v44 = vpack.c.bf16 %v1989_v55, %v1988_v26  ;;  %v1757_v32 = vadd.f32 %v1731_v18, %v1530_v27 }
 0x161   : > { %2725 = vst [vmem:[%s3203_s28 + $0x10] sm:$0xff] %v2712_v44   ;;  %v1942_v39 = vadd.f32 %v1916_v23, %v1757_v32 }
 0x163   : > { %v1325_v15 = vpop.f32.mrf.mxu1  ;;  %v1976_v46 = vmul.f32 %v3188_v35, %v1942_v39  ;;  %v1921_v52 = vpop.f32.mrf.mxu0 }
 0x164   : > { %v1506_v28 = vpop.f32.mrf.mxu2  ;;  %v1348_v43 = vadd.f32 %v1325_v15, %v3179_v13 }
 0x165   : > { %v1531_v62 = vadd.f32 %v1506_v28, %v1347_v34  ;;  %v1990_v29 = vadd.f32 %v3195_v45, %v1976_v46 }
 0x167   : > { %v1758_v41 = vadd.f32 %v1733_v36, %v1531_v62 }
 0x169   : > { %v1943_v47 = vadd.f32 %v1918_v4, %v1758_v41 }
 0x16b   : > { %v1977_v48 = vmul.f32 %v3188_v35, %v1943_v47  ;;  %v1327_v30 = vpop.f32.mrf.mxu1  ;;  %v1923_v16 = vpop.f32.mrf.mxu0 }
 0x16c   : > { %v1509_v42 = vpop.f32.mrf.mxu2  ;;  %v1349_v56 = vadd.f32 %v1327_v30, %v3182_v22 }
 0x16d   : > { %v1991_v50 = vadd.f32 %v3195_v45, %v1977_v48  ;;  %v1532_v51 = vadd.f32 %v1509_v42, %v1348_v43 }
 0x16f   : > { %v2717_v53 = vpack.c.bf16 %v1991_v50, %v1990_v29  ;;  %v1759_v54 = vadd.f32 %v1736_v37, %v1532_v51 }
 0x171   : > { %2726 = vst [vmem:[%s3203_s28 + $0x18] sm:$0xff] %v2717_v53   ;;  %v1944_v7 = vadd.f32 %v1921_v52, %v1759_v54 }
 0x173   : > { %v1978_v13 = vmul.f32 %v3188_v35, %v1944_v7 }
 0x174   : > { %v1511_v57 = vpop.f32.mrf.mxu2 }
 0x175   : > { %v1992_v58 = vadd.f32 %v3195_v45, %v1978_v13  ;;  %v1533_v59 = vadd.f32 %v1511_v57, %v1349_v56 }
 0x177   : > { %v1760_v61 = vadd.f32 %v1738_v60, %v1533_v59 }
 0x179   : > { %v1945_v63 = vadd.f32 %v1923_v16, %v1760_v61 }
 0x17b   : > { %v1979_v22 = vmul.f32 %v3188_v35, %v1945_v63 }
 0x17d   : > { %v1993_v0 = vadd.f32 %v3195_v45, %v1979_v22 }
 0x17f   : > { %v2722_v1 = vpack.c.bf16 %v1993_v0, %v1992_v58 }
 0x181   : > { %2727 = vst [vmem:[%s3203_s28 + $0x20] sm:$0xff] %v2722_v1  }
 0x182   : > { %2860 = shalt.err (!%p2857_p8)
}
 0x183   : > { %s2904_s20 = smov 64   ;;  %s2905_s23 = smov 4  }
 0x184   : > { %2751 = dma.vmem_to_hbm [thread:$0]  (%p2969_p5), %s2028_s7, 640, %s2030_s8, %s2015_s19, %s2904_s20, %s2904_s20, %s2905_s23  }
 0x185 PF: > { %p2763_p9 = scmp.ge.s32.totalorder %s2899_s18, 2  ;;  %s2044_s27 = sand.u32 1, %s2887_s15  }
 0x186   : > { %s2045_s28 = scalar_lea.sflag [#allocation5], %s2044_s27 }
 0x187   : > { %p2758_p10 = pnand %p2763_p9, %p2973_p6 }
 0x189   : > { %p2759_p11 = pneg %p2758_p10 }
 0x18b   : > { %2882 = dma.done.wait (%p2759_p11), %s2045_s28, 640  }
 0x18c   : > { %2884 = vsyncadd (%p2759_p11), %s2045_s28, 4294966656  ;;  %p15_p12 = scmp.ge.s32.totalorder %s2956_s21, 6   ;;  %s3274_s15 = smov %s2891_s16 }
 0x18d   : > { %s3275_s16 = smov %s2895_s17  ;;  %s3276_s17 = smov %s2967_s24 }
 0x18e   : > { %s3277_s18 = smov %s2956_s21  ;;  %17 = sbr.rel (!%p15_p12) target bundleno = 4 (0x4), region = 84 }
 0x193   :  { %2051 = vsyncpa [#allocation4], 1 }
 0x194   :  { %2053 = vsyncpa [#allocation4 + $0x1], 1 }
 0x195   :  { %2054 = vsyncpa [#allocation5], 1 }
 0x196   :  { %2056 = vsyncpa [#allocation5 + $0x1], 1 }

</bundles_post_ra>
